<compile_context>
chip_gen: v7x
topology: tpu7x:2x2x1
jax: 0.10.0
libtpu: 0.0.40
codegen_flags: <defaults>
</compile_context>

<pallas_src>
import functools
import math

import jax
import jax.numpy as jnp
from jax import lax
from jax.experimental import pallas as pl
from jax.experimental.pallas import tpu as pltpu

KH = KW = 3          # kernel size
PAD = 1              # padding
EPS = 1e-5           # BatchNorm2d default eps
NEG_SLOPE = 0.01     # LeakyReLU default negative_slope


def _round_up(x, m):
    return (x + m - 1) // m * m


def _vmem_limit_bytes():
    """Generation-aware scoped-VMEM budget (v5e/v6e: 128 MiB, v7x: 64 MiB/TC)."""
    try:
        info = pltpu.get_tpu_info()
        cap = int(getattr(info, "vmem_capacity_bytes", 64 * 1024 * 1024))
    except Exception:
        cap = 64 * 1024 * 1024  # conservative fallback = v7x per-TC VMEM
    return max(16 * 1024 * 1024, min(cap * 5 // 8, 80 * 1024 * 1024))


def _pass1_tile_bytes(th, W, Cin, Cout, in_bytes, conv_bytes):
    """VMEM footprint of one pass-1 grid step (pipeline buffers + working set)."""
    sub = max(8, 32 // in_bytes)
    wp = _round_up(W + 2 * PAD, 128)
    lanes = _round_up(th * W, 128)
    cin8, cout8 = _round_up(Cin, sub), _round_up(Cout, 8)
    main = Cin * _round_up(th, sub) * wp * in_bytes
    halo = Cin * sub * wp * in_bytes
    wts = KH * KW * cout8 * _round_up(Cin, 128) * in_bytes
    conv = cout8 * lanes * conv_bytes
    stats = cout8 * 128 * 4
    pipeline = 2 * (main + halo + wts + conv + stats)          # double buffers
    work = (Cin * _round_up(th + 2 * PAD, sub) * wp * in_bytes  # stitched window
            + 3 * cin8 * lanes * in_bytes                       # tap temporaries
            + cout8 * lanes * 4)                                # f32 accumulator
    return pipeline + work


def _pick_row_tile(H, W, N, Cin, Cout, in_bytes, conv_bytes, budget):
    """Row tile TH (sublane-aligned; TH*W % 128 == 0 unless single tile) + H_pad."""
    sub = max(8, 32 // in_bytes)                 # 8 for f32, 16 for bf16
    lane_unit = 128 // math.gcd(W, 128)          # TH multiple of this -> TH*W % 128 == 0
    unit = sub * lane_unit // math.gcd(sub, lane_unit)
    hsub = _round_up(H, sub)
    if unit >= hsub:
        # One H tile per image: the conv block's last dim is the full H_pad*W.
        # TODO(synk): add a W grid axis if a whole image ever exceeds the budget.
        return hsub, hsub
    h_pad = _round_up(H, unit)
    cands = [t for t in range(unit, h_pad + 1, unit) if h_pad % t == 0]
    fits = [t for t in cands
            if _pass1_tile_bytes(t, W, Cin, Cout, in_bytes, conv_bytes) <= budget]
    if not fits:
        fits = [unit]   # TODO(synk): add W tiling for pathologically wide rows
    th = max(fits)
    # v7x has 2 TensorCores per chip: keep at least 2 parallel grid steps.
    if N * (h_pad // th) < 2:
        two = [t for t in fits if h_pad // t >= 2]
        if two:
            th = max(two)
    return th, h_pad


def _conv_stats_kernel(x_main_ref, x_halo_ref, w_ref, conv_ref, stats_ref, *,
                       th, w_img, h_img, row_pad):
    """One (image, H-tile) step: 3x3 conv tile + per-tile BN partial sums."""
    cin = x_main_ref.shape[0]
    cout = conv_ref.shape[0]
    pix = th * w_img

    # Stitch the haloed window (Cin, TH+2, W+2) from the two pipelined blocks
    # (main rows [t*TH, t*TH+TH), halo rows [ (t+1)*TH, (t+1)*TH+2 )).
    xwin = jnp.concatenate([x_main_ref[...], x_halo_ref[:, :2 * PAD, :]], axis=1)

    # 9 per-tap MXU matmuls accumulated in f32 (no patches buffer, no wide
    # concatenate).  TODO(synk): switch to a single wide-K matmul built in a
    # VMEM scratch when 9*Cin >= 256.
    acc = jnp.zeros((cout, pix), jnp.float32)
    for kh in range(KH):
        xh = xwin[:, kh:kh + th, :]                          # (Cin, TH, W+2)
        for kw in range(KW):
            xt = xh[:, :, kw:kw + w_img].reshape(cin, pix)   # (Cin, TH*W)
            acc = acc + jnp.dot(w_ref[kh * KW + kw], xt,
                                preferred_element_type=jnp.float32)

    # Lane-dense store of the conv tile (downcast only at the store; the BN
    # partial sums below come from the full-precision accumulator).
    conv_ref[...] = acc.astype(conv_ref.dtype)

    # BN partial sums for this tile.  Rows >= H (H was padded up to a multiple
    # of the row tile) are excluded so the batch statistics stay exact.
    if row_pad:
        t = pl.program_id(1)
        lane = lax.broadcasted_iota(jnp.int32, (1, pix), 1)
        valid = lane < (h_img - t * th) * w_img
        acc = jnp.where(valid, acc, 0.0)
    s = jnp.sum(acc, axis=1, keepdims=True)                  # (Cout, 1)
    sq = jnp.sum(acc * acc, axis=1, keepdims=True)           # (Cout, 1)
    stats_ref[...] = jnp.concatenate([s, sq], axis=1)        # (Cout, 2)


def _bn_lrelu_kernel(conv_ref, scale_ref, shift_ref, o_ref):
    """Fused BN affine + LeakyReLU over a large lane-dense tile."""
    y = conv_ref[...].astype(jnp.float32) * scale_ref[...] + shift_ref[...]
    o_ref[...] = jnp.where(y >= 0, y, NEG_SLOPE * y).astype(o_ref.dtype)


def cbl_forward(x_nchw, w_oihw, conv_bias, gamma, beta, *, row_tile=None,
                compute_dtype=jnp.bfloat16):
    """CBL forward. x_nchw: (N, Cin, H, W) float32, PyTorch layout.

    The Conv2d bias is intentionally not applied: with training-mode BatchNorm
    the per-channel bias is exactly cancelled by the batch-mean subtraction.
    (If eval-mode running stats were ever used, the bias must be re-applied.)
    """
    del conv_bias
    N, Cin, H, W = map(int, x_nchw.shape)
    Cout = int(w_oihw.shape[0])
    Wp = W + 2 * PAD

    in_bytes = jnp.dtype(compute_dtype).itemsize
    conv_dtype = compute_dtype                  # inter-pass conv buffer dtype
    conv_bytes = jnp.dtype(conv_dtype).itemsize
    sub_unit = max(8, 32 // in_bytes)           # sublane granularity for blocks
    vmem_limit = _vmem_limit_bytes()
    budget = int(vmem_limit * 0.85)

    if row_tile is None:
        TH, H_pad = _pick_row_tile(H, W, N, Cin, Cout, in_bytes, conv_bytes, budget)
    else:
        TH = int(row_tile)
        assert TH % sub_unit == 0, "row_tile must be sublane-aligned for this dtype"
        H_pad = _round_up(H, TH)
        assert (TH * W) % 128 == 0 or H_pad == TH, \
            "row_tile*W must be a multiple of 128 (or a single tile per image)"
    nt = H_pad // TH
    pix = TH * W
    hw_pad = H_pad * W

    # ---- the only pre-kernel layout op: one fused cast + spatial zero-pad ----
    # Rows: 1 (top conv pad) + H real + enough zero rows that the last tile's
    # halo block stays fully in bounds.  No transposes, no halo stack in HBM.
    bot = H_pad + sub_unit - H - PAD
    x_pad = jnp.pad(x_nchw.astype(compute_dtype),
                    ((0, 0), (0, 0), (PAD, bot), (PAD, PAD)))

    # Per-tap conv weights: OIHW -> (9, Cout, Cin), tap index = kh*3 + kw.
    w_taps = jnp.transpose(w_oihw, (2, 3, 0, 1)).reshape(KH * KW, Cout, Cin)
    w_taps = w_taps.astype(compute_dtype)

    cparams = pltpu.CompilerParams(
        dimension_semantics=("parallel", "parallel"),
        vmem_limit_bytes=vmem_limit)

    kern1 = functools.partial(_conv_stats_kernel, th=TH, w_img=W, h_img=H,
                              row_pad=(H_pad != H))

    conv_cost = pl.CostEstimate(
        flops=2 * N * H_pad * W * KH * KW * Cin * Cout,
        transcendentals=0,
        bytes_accessed=(x_pad.size * in_bytes + w_taps.size * in_bytes
                        + N * Cout * hw_pad * conv_bytes + N * nt * Cout * 2 * 4))

    # ---- pass 1: conv tiles (lane-dense, last dim TH*W) + BN partial sums ----
    # x_pad is passed twice: once as the TH-row main block, once as the small
    # halo block (overlapping windows are not expressible with one Blocked spec).
    # TODO(synk): pin the invariant weight block with pipeline_mode=pl.Buffered(1)
    # and add a Cout grid axis for very large Cout to trim weight/acc VMEM.
    conv_out, stats = pl.pallas_call(
        kern1,
        grid=(N, nt),
        in_specs=[
            pl.BlockSpec((None, Cin, TH, Wp), lambda n, t: (n, 0, t, 0)),
            pl.BlockSpec((None, Cin, sub_unit, Wp),
                         lambda n, t: (n, 0, (t + 1) * (TH // sub_unit), 0)),
            pl.BlockSpec((KH * KW, Cout, Cin), lambda n, t: (0, 0, 0)),
        ],
        out_specs=[
            pl.BlockSpec((None, Cout, pix), lambda n, t: (n, 0, t)),
            pl.BlockSpec((None, None, Cout, 2), lambda n, t: (n, t, 0, 0)),
        ],
        out_shape=[
            jax.ShapeDtypeStruct((N, Cout, hw_pad), conv_dtype),
            jax.ShapeDtypeStruct((N, nt, Cout, 2), jnp.float32),
        ],
        compiler_params=cparams,
        cost_estimate=conv_cost,
    )(x_pad, x_pad, w_taps)

    # ---- tiny cross-tile BN reduction + affine folding (plain JAX, f32) ----
    count = N * H * W
    ch_sum = jnp.sum(stats[..., 0], axis=(0, 1))              # (Cout,)
    ch_sqsum = jnp.sum(stats[..., 1], axis=(0, 1))            # (Cout,)
    mean = ch_sum / count
    var = jnp.maximum(ch_sqsum / count - mean * mean, 0.0)    # biased var (training BN)
    # TODO(synk): switch to shifted/two-pass stats if E[x^2]-E[x]^2 cancellation
    # ever matters at very large N*H*W.
    scale = gamma.astype(jnp.float32) * lax.rsqrt(var + EPS)
    shift = beta.astype(jnp.float32) - mean * scale
    scale_c = scale.reshape(Cout, 1)
    shift_c = shift.reshape(Cout, 1)

    # ---- pass 2: fused BN affine + LeakyReLU on big lane-dense tiles ----
    budget2 = vmem_limit // 2
    q = 1
    for cand in range(nt, 0, -1):
        if nt % cand:
            continue
        blk = 2 * _round_up(Cout, 8) * _round_up(cand * pix, 128) * (conv_bytes + 4)
        if blk <= budget2:
            q = cand
            break
    chunk = q * pix
    nc = nt // q

    bn_cost = pl.CostEstimate(
        flops=3 * N * Cout * hw_pad, transcendentals=0,
        bytes_accessed=N * Cout * hw_pad * (conv_bytes + 4))

    y = pl.pallas_call(
        _bn_lrelu_kernel,
        grid=(N, nc),
        in_specs=[
            pl.BlockSpec((None, Cout, chunk), lambda n, c: (n, 0, c)),
            pl.BlockSpec((Cout, 1), lambda n, c: (0, 0)),
            pl.BlockSpec((Cout, 1), lambda n, c: (0, 0)),
        ],
        out_specs=pl.BlockSpec((None, Cout, chunk), lambda n, c: (n, 0, c)),
        out_shape=jax.ShapeDtypeStruct((N, Cout, hw_pad), jnp.float32),
        compiler_params=cparams,
        cost_estimate=bn_cost,
    )(conv_out, scale_c, shift_c)

    # (N, Cout, H_pad*W) is already NCHW row-major; drop the pad rows if any.
    y = y.reshape(N, Cout, H_pad, W)
    if H_pad != H:
        y = y[:, :, :H, :]
    return y


def _ref_cbl(x_nchw, w_oihw, bias, gamma, beta):
    y = lax.conv_general_dilated(
        x_nchw, w_oihw, window_strides=(1, 1), padding=((PAD, PAD), (PAD, PAD)),
        dimension_numbers=("NCHW", "OIHW", "NCHW"))
    y = y + bias[None, :, None, None]
    mean = y.mean(axis=(0, 2, 3), keepdims=True)
    var = ((y - mean) ** 2).mean(axis=(0, 2, 3), keepdims=True)
    y = (y - mean) / jnp.sqrt(var + EPS)
    y = y * gamma[None, :, None, None] + beta[None, :, None, None]
    return jnp.where(y >= 0, y, NEG_SLOPE * y)


if __name__ == "__main__":
    # Small deterministic setup: N=2, Cin=4, Cout=8, H=W=16.
    N, Cin, Cout, H, W = 2, 4, 8, 16, 16
    key = jax.random.PRNGKey(0)
    kx, kw, kb, kg, kbt = jax.random.split(key, 5)

    x = jax.random.normal(kx, (N, Cin, H, W), dtype=jnp.float32)
    w = jax.random.normal(kw, (Cout, Cin, KH, KW), dtype=jnp.float32) * 0.1
    b = jax.random.normal(kb, (Cout,), dtype=jnp.float32) * 0.1
    gamma = 1.0 + 0.1 * jax.random.normal(kg, (Cout,), dtype=jnp.float32)
    beta = 0.1 * jax.random.normal(kbt, (Cout,), dtype=jnp.float32)

    ref = jax.block_until_ready(_ref_cbl(x, w, b, gamma, beta))

    # f32 path (bit-faithful to the PyTorch module); row_tile=8 gives 2 H-tiles
    # per image so the cross-tile BN reduction and halo stitching are exercised.
    fwd_f32 = jax.jit(functools.partial(cbl_forward, row_tile=8,
                                        compute_dtype=jnp.float32))
    out = jax.block_until_ready(fwd_f32(x, w, b, gamma, beta))
    assert out.shape == (N, Cout, H, W)
    assert jnp.allclose(out, ref, atol=1e-4, rtol=1e-4), "f32 mismatch vs reference"

    # Default path: bf16 MXU operands + bf16 inter-pass conv buffer on every
    # generation (only the MXU sees bf16; BN stats and the epilogue stay f32,
    # so results differ from f32 only by operand/intermediate rounding).
    fwd_def = jax.jit(cbl_forward)
    out_bf16 = jax.block_until_ready(fwd_def(x, w, b, gamma, beta))
    assert out_bf16.shape == (N, Cout, H, W)
    assert jnp.allclose(out_bf16, ref, atol=5e-2, rtol=5e-2), "bf16 mismatch vs reference"

    print("KERNEL_OK")
</pallas_src>

<mosaic_0001>
module attributes {stable_mosaic.version = 11 : i64} {
  func.func @_conv_stats_kernel(%arg0: i32, %arg1: i32, %arg2: memref<1x4x8x18xf32, #tpu.memory_space<vmem>>, %arg3: memref<1x4x8x18xf32, #tpu.memory_space<vmem>>, %arg4: memref<9x8x4xf32, #tpu.memory_space<vmem>>, %arg5: memref<1x8x128xf32, #tpu.memory_space<vmem>>, %arg6: memref<1x1x8x2xf32, #tpu.memory_space<vmem>>) attributes {dimension_semantics = [#tpu.dimension_semantics<parallel>, #tpu.dimension_semantics<parallel>], iteration_bounds = array<i64: 2, 2>, scalar_prefetch = 0 : i64, scratch_operands = 0 : i64, tpu.core_type = #tpu.core_type<tc>, window_params = [{transform_indices = @transform_0, window_bounds = array<i64: 1, 4, 8, 18>}, {transform_indices = @transform_1, window_bounds = array<i64: 1, 4, 8, 18>}, {pipeline_mode = #tpu.pipeline_mode<synchronous>, transform_indices = @transform_2, window_bounds = array<i64: 9, 8, 4>}, {transform_indices = @transform_3, window_bounds = array<i64: 1, 8, 128>}, {transform_indices = @transform_4, window_bounds = array<i64: 1, 1, 8, 2>}]} {
    %c0 = arith.constant 0 : index
    %c0_0 = arith.constant 0 : index
    %c0_1 = arith.constant 0 : index
    %c0_2 = arith.constant 0 : index
    %0 = vector.load %arg2[%c0, %c0_0, %c0_1, %c0_2] : memref<1x4x8x18xf32, #tpu.memory_space<vmem>>, vector<1x4x8x18xf32>
    %1 = vector.shape_cast %0 : vector<1x4x8x18xf32> to vector<4x8x18xf32>
    %c0_3 = arith.constant 0 : index
    %c0_4 = arith.constant 0 : index
    %c0_5 = arith.constant 0 : index
    %c0_6 = arith.constant 0 : index
    %2 = vector.load %arg3[%c0_3, %c0_4, %c0_5, %c0_6] : memref<1x4x8x18xf32, #tpu.memory_space<vmem>>, vector<1x4x2x18xf32>
    %3 = vector.shape_cast %2 : vector<1x4x2x18xf32> to vector<4x2x18xf32>
    %4 = tpu.concatenate %1, %3 in 1 : vector<4x8x18xf32>, vector<4x2x18xf32> -> vector<4x10x18xf32>
    %cst = arith.constant 0.000000e+00 : f32
    %5 = vector.broadcast %cst : f32 to vector<8x128xf32>
    %6 = vector.extract_strided_slice %4 {offsets = [0, 0, 0], sizes = [4, 8, 18], strides = [1, 1, 1]} : vector<4x10x18xf32> to vector<4x8x18xf32>
    %7 = vector.extract_strided_slice %6 {offsets = [0, 0, 0], sizes = [4, 8, 16], strides = [1, 1, 1]} : vector<4x8x18xf32> to vector<4x8x16xf32>
    %8 = vector.shape_cast %7 : vector<4x8x16xf32> to vector<4x128xf32>
    %c0_7 = arith.constant 0 : index
    %c0_8 = arith.constant 0 : index
    %c0_9 = arith.constant 0 : index
    %9 = vector.load %arg4[%c0_7, %c0_8, %c0_9] : memref<9x8x4xf32, #tpu.memory_space<vmem>>, vector<1x8x4xf32>
    %10 = vector.shape_cast %9 : vector<1x8x4xf32> to vector<8x4xf32>
    %cst_10 = arith.constant dense<0.000000e+00> : vector<8x128xf32>
    %11 = tpu.matmul %10, %8, %cst_10 {dimension_numbers = #tpu.dot_dimension_numbers<[1], [0], [0], [1], [0, 0, 1, 1], [], []>} : vector<8x4xf32>, vector<4x128xf32>, vector<8x128xf32> -> vector<8x128xf32>
    %12 = arith.addf %5, %11 : vector<8x128xf32>
    %13 = vector.extract_strided_slice %6 {offsets = [0, 0, 1], sizes = [4, 8, 16], strides = [1, 1, 1]} : vector<4x8x18xf32> to vector<4x8x16xf32>
    %14 = vector.shape_cast %13 : vector<4x8x16xf32> to vector<4x128xf32>
    %c1 = arith.constant 1 : index
    %c0_11 = arith.constant 0 : index
    %c0_12 = arith.constant 0 : index
    %15 = vector.load %arg4[%c1, %c0_11, %c0_12] : memref<9x8x4xf32, #tpu.memory_space<vmem>>, vector<1x8x4xf32>
    %16 = vector.shape_cast %15 : vector<1x8x4xf32> to vector<8x4xf32>
    %cst_13 = arith.constant dense<0.000000e+00> : vector<8x128xf32>
    %17 = tpu.matmul %16, %14, %cst_13 {dimension_numbers = #tpu.dot_dimension_numbers<[1], [0], [0], [1], [0, 0, 1, 1], [], []>} : vector<8x4xf32>, vector<4x128xf32>, vector<8x128xf32> -> vector<8x128xf32>
    %18 = arith.addf %12, %17 : vector<8x128xf32>
    %19 = vector.extract_strided_slice %6 {offsets = [0, 0, 2], sizes = [4, 8, 16], strides = [1, 1, 1]} : vector<4x8x18xf32> to vector<4x8x16xf32>
    %20 = vector.shape_cast %19 : vector<4x8x16xf32> to vector<4x128xf32>
    %c2 = arith.constant 2 : index
    %c0_14 = arith.constant 0 : index
    %c0_15 = arith.constant 0 : index
    %21 = vector.load %arg4[%c2, %c0_14, %c0_15] : memref<9x8x4xf32, #tpu.memory_space<vmem>>, vector<1x8x4xf32>
    %22 = vector.shape_cast %21 : vector<1x8x4xf32> to vector<8x4xf32>
    %cst_16 = arith.constant dense<0.000000e+00> : vector<8x128xf32>
    %23 = tpu.matmul %22, %20, %cst_16 {dimension_numbers = #tpu.dot_dimension_numbers<[1], [0], [0], [1], [0, 0, 1, 1], [], []>} : vector<8x4xf32>, vector<4x128xf32>, vector<8x128xf32> -> vector<8x128xf32>
    %24 = arith.addf %18, %23 : vector<8x128xf32>
    %25 = vector.extract_strided_slice %4 {offsets = [0, 1, 0], sizes = [4, 8, 18], strides = [1, 1, 1]} : vector<4x10x18xf32> to vector<4x8x18xf32>
    %26 = vector.extract_strided_slice %25 {offsets = [0, 0, 0], sizes = [4, 8, 16], strides = [1, 1, 1]} : vector<4x8x18xf32> to vector<4x8x16xf32>
    %27 = vector.shape_cast %26 : vector<4x8x16xf32> to vector<4x128xf32>
    %c3 = arith.constant 3 : index
    %c0_17 = arith.constant 0 : index
    %c0_18 = arith.constant 0 : index
    %28 = vector.load %arg4[%c3, %c0_17, %c0_18] : memref<9x8x4xf32, #tpu.memory_space<vmem>>, vector<1x8x4xf32>
    %29 = vector.shape_cast %28 : vector<1x8x4xf32> to vector<8x4xf32>
    %cst_19 = arith.constant dense<0.000000e+00> : vector<8x128xf32>
    %30 = tpu.matmul %29, %27, %cst_19 {dimension_numbers = #tpu.dot_dimension_numbers<[1], [0], [0], [1], [0, 0, 1, 1], [], []>} : vector<8x4xf32>, vector<4x128xf32>, vector<8x128xf32> -> vector<8x128xf32>
    %31 = arith.addf %24, %30 : vector<8x128xf32>
    %32 = vector.extract_strided_slice %25 {offsets = [0, 0, 1], sizes = [4, 8, 16], strides = [1, 1, 1]} : vector<4x8x18xf32> to vector<4x8x16xf32>
    %33 = vector.shape_cast %32 : vector<4x8x16xf32> to vector<4x128xf32>
    %c4 = arith.constant 4 : index
    %c0_20 = arith.constant 0 : index
    %c0_21 = arith.constant 0 : index
    %34 = vector.load %arg4[%c4, %c0_20, %c0_21] : memref<9x8x4xf32, #tpu.memory_space<vmem>>, vector<1x8x4xf32>
    %35 = vector.shape_cast %34 : vector<1x8x4xf32> to vector<8x4xf32>
    %cst_22 = arith.constant dense<0.000000e+00> : vector<8x128xf32>
    %36 = tpu.matmul %35, %33, %cst_22 {dimension_numbers = #tpu.dot_dimension_numbers<[1], [0], [0], [1], [0, 0, 1, 1], [], []>} : vector<8x4xf32>, vector<4x128xf32>, vector<8x128xf32> -> vector<8x128xf32>
    %37 = arith.addf %31, %36 : vector<8x128xf32>
    %38 = vector.extract_strided_slice %25 {offsets = [0, 0, 2], sizes = [4, 8, 16], strides = [1, 1, 1]} : vector<4x8x18xf32> to vector<4x8x16xf32>
    %39 = vector.shape_cast %38 : vector<4x8x16xf32> to vector<4x128xf32>
    %c5 = arith.constant 5 : index
    %c0_23 = arith.constant 0 : index
    %c0_24 = arith.constant 0 : index
    %40 = vector.load %arg4[%c5, %c0_23, %c0_24] : memref<9x8x4xf32, #tpu.memory_space<vmem>>, vector<1x8x4xf32>
    %41 = vector.shape_cast %40 : vector<1x8x4xf32> to vector<8x4xf32>
    %cst_25 = arith.constant dense<0.000000e+00> : vector<8x128xf32>
    %42 = tpu.matmul %41, %39, %cst_25 {dimension_numbers = #tpu.dot_dimension_numbers<[1], [0], [0], [1], [0, 0, 1, 1], [], []>} : vector<8x4xf32>, vector<4x128xf32>, vector<8x128xf32> -> vector<8x128xf32>
    %43 = arith.addf %37, %42 : vector<8x128xf32>
    %44 = vector.extract_strided_slice %4 {offsets = [0, 2, 0], sizes = [4, 8, 18], strides = [1, 1, 1]} : vector<4x10x18xf32> to vector<4x8x18xf32>
    %45 = vector.extract_strided_slice %44 {offsets = [0, 0, 0], sizes = [4, 8, 16], strides = [1, 1, 1]} : vector<4x8x18xf32> to vector<4x8x16xf32>
    %46 = vector.shape_cast %45 : vector<4x8x16xf32> to vector<4x128xf32>
    %c6 = arith.constant 6 : index
    %c0_26 = arith.constant 0 : index
    %c0_27 = arith.constant 0 : index
    %47 = vector.load %arg4[%c6, %c0_26, %c0_27] : memref<9x8x4xf32, #tpu.memory_space<vmem>>, vector<1x8x4xf32>
    %48 = vector.shape_cast %47 : vector<1x8x4xf32> to vector<8x4xf32>
    %cst_28 = arith.constant dense<0.000000e+00> : vector<8x128xf32>
    %49 = tpu.matmul %48, %46, %cst_28 {dimension_numbers = #tpu.dot_dimension_numbers<[1], [0], [0], [1], [0, 0, 1, 1], [], []>} : vector<8x4xf32>, vector<4x128xf32>, vector<8x128xf32> -> vector<8x128xf32>
    %50 = arith.addf %43, %49 : vector<8x128xf32>
    %51 = vector.extract_strided_slice %44 {offsets = [0, 0, 1], sizes = [4, 8, 16], strides = [1, 1, 1]} : vector<4x8x18xf32> to vector<4x8x16xf32>
    %52 = vector.shape_cast %51 : vector<4x8x16xf32> to vector<4x128xf32>
    %c7 = arith.constant 7 : index
    %c0_29 = arith.constant 0 : index
    %c0_30 = arith.constant 0 : index
    %53 = vector.load %arg4[%c7, %c0_29, %c0_30] : memref<9x8x4xf32, #tpu.memory_space<vmem>>, vector<1x8x4xf32>
    %54 = vector.shape_cast %53 : vector<1x8x4xf32> to vector<8x4xf32>
    %cst_31 = arith.constant dense<0.000000e+00> : vector<8x128xf32>
    %55 = tpu.matmul %54, %52, %cst_31 {dimension_numbers = #tpu.dot_dimension_numbers<[1], [0], [0], [1], [0, 0, 1, 1], [], []>} : vector<8x4xf32>, vector<4x128xf32>, vector<8x128xf32> -> vector<8x128xf32>
    %56 = arith.addf %50, %55 : vector<8x128xf32>
    %57 = vector.extract_strided_slice %44 {offsets = [0, 0, 2], sizes = [4, 8, 16], strides = [1, 1, 1]} : vector<4x8x18xf32> to vector<4x8x16xf32>
    %58 = vector.shape_cast %57 : vector<4x8x16xf32> to vector<4x128xf32>
    %c8 = arith.constant 8 : index
    %c0_32 = arith.constant 0 : index
    %c0_33 = arith.constant 0 : index
    %59 = vector.load %arg4[%c8, %c0_32, %c0_33] : memref<9x8x4xf32, #tpu.memory_space<vmem>>, vector<1x8x4xf32>
    %60 = vector.shape_cast %59 : vector<1x8x4xf32> to vector<8x4xf32>
    %cst_34 = arith.constant dense<0.000000e+00> : vector<8x128xf32>
    %61 = tpu.matmul %60, %58, %cst_34 {dimension_numbers = #tpu.dot_dimension_numbers<[1], [0], [0], [1], [0, 0, 1, 1], [], []>} : vector<8x4xf32>, vector<4x128xf32>, vector<8x128xf32> -> vector<8x128xf32>
    %62 = arith.addf %56, %61 : vector<8x128xf32>
    %c0_35 = arith.constant 0 : index
    %c0_36 = arith.constant 0 : index
    %c0_37 = arith.constant 0 : index
    %63 = vector.load %arg5[%c0_35, %c0_36, %c0_37] : memref<1x8x128xf32, #tpu.memory_space<vmem>>, vector<1x8x128xf32>
    %64 = vector.shape_cast %63 : vector<1x8x128xf32> to vector<8x128xf32>
    %65 = vector.shape_cast %62 : vector<8x128xf32> to vector<1x8x128xf32>
    tpu.vector_store %arg5[%c0_35, %c0_36, %c0_37], %65 {strides = array<i32>} : memref<1x8x128xf32, #tpu.memory_space<vmem>>, vector<1x8x128xf32>,
    %cst_38 = arith.constant dense<0.000000e+00> : vector<8xf32>
    %66 = vector.multi_reduction <add>, %62, %cst_38 [1] : vector<8x128xf32> to vector<8xf32>
    %67 = vector.shape_cast %66 : vector<8xf32> to vector<8x1xf32>
    %68 = arith.mulf %62, %62 : vector<8x128xf32>
    %cst_39 = arith.constant dense<0.000000e+00> : vector<8xf32>
    %69 = vector.multi_reduction <add>, %68, %cst_39 [1] : vector<8x128xf32> to vector<8xf32>
    %70 = vector.shape_cast %69 : vector<8xf32> to vector<8x1xf32>
    %71 = tpu.concatenate %67, %70 in 1 : vector<8x1xf32>, vector<8x1xf32> -> vector<8x2xf32>
    %c0_40 = arith.constant 0 : index
    %c0_41 = arith.constant 0 : index
    %c0_42 = arith.constant 0 : index
    %c0_43 = arith.constant 0 : index
    %72 = vector.load %arg6[%c0_40, %c0_41, %c0_42, %c0_43] : memref<1x1x8x2xf32, #tpu.memory_space<vmem>>, vector<1x1x8x2xf32>
    %73 = vector.shape_cast %72 : vector<1x1x8x2xf32> to vector<8x2xf32>
    %74 = vector.shape_cast %71 : vector<8x2xf32> to vector<1x1x8x2xf32>
    tpu.vector_store %arg6[%c0_40, %c0_41, %c0_42, %c0_43], %74 {strides = array<i32>} : memref<1x1x8x2xf32, #tpu.memory_space<vmem>>, vector<1x1x8x2xf32>,
    return
  }
  func.func @transform_0(%arg0: i32, %arg1: i32) -> (i32, i32, i32, i32) {
    %c0_i32 = arith.constant 0 : i32
    %c0_i32_0 = arith.constant 0 : i32
    %c0_i32_1 = arith.constant 0 : i32
    return %arg0, %c0_i32, %arg1, %c0_i32_0 : i32, i32, i32, i32
  }
  func.func @transform_1(%arg0: i32, %arg1: i32) -> (i32, i32, i32, i32) {
    %c1_i32 = arith.constant 1 : i32
    %0 = arith.addi %arg1, %c1_i32 : i32
    %c1_i32_0 = arith.constant 1 : i32
    %1 = arith.muli %0, %c1_i32_0 : i32
    %c0_i32 = arith.constant 0 : i32
    %c0_i32_1 = arith.constant 0 : i32
    %c0_i32_2 = arith.constant 0 : i32
    return %arg0, %c0_i32, %1, %c0_i32_1 : i32, i32, i32, i32
  }
  func.func @transform_2(%arg0: i32, %arg1: i32) -> (i32, i32, i32) {
    %c0_i32 = arith.constant 0 : i32
    %c0_i32_0 = arith.constant 0 : i32
    %c0_i32_1 = arith.constant 0 : i32
    %c0_i32_2 = arith.constant 0 : i32
    return %c0_i32, %c0_i32_0, %c0_i32_1 : i32, i32, i32
  }
  func.func @transform_3(%arg0: i32, %arg1: i32) -> (i32, i32, i32) {
    %c0_i32 = arith.constant 0 : i32
    %c0_i32_0 = arith.constant 0 : i32
    return %arg0, %c0_i32, %arg1 : i32, i32, i32
  }
  func.func @transform_4(%arg0: i32, %arg1: i32) -> (i32, i32, i32, i32) {
    %c0_i32 = arith.constant 0 : i32
    %c0_i32_0 = arith.constant 0 : i32
    %c0_i32_1 = arith.constant 0 : i32
    return %arg0, %arg1, %c0_i32, %c0_i32_0 : i32, i32, i32, i32
  }
}

module attributes {stable_mosaic.version = 11 : i64} {
  func.func @_bn_lrelu_kernel(%arg0: i32, %arg1: i32, %arg2: memref<1x8x256xf32, #tpu.memory_space<vmem>>, %arg3: memref<8x1xf32, #tpu.memory_space<vmem>>, %arg4: memref<8x1xf32, #tpu.memory_space<vmem>>, %arg5: memref<1x8x256xf32, #tpu.memory_space<vmem>>) attributes {dimension_semantics = [#tpu.dimension_semantics<parallel>, #tpu.dimension_semantics<parallel>], iteration_bounds = array<i64: 2, 1>, scalar_prefetch = 0 : i64, scratch_operands = 0 : i64, tpu.core_type = #tpu.core_type<tc>, window_params = [{transform_indices = @transform_0, window_bounds = array<i64: 1, 8, 256>}, {pipeline_mode = #tpu.pipeline_mode<synchronous>, transform_indices = @transform_1, window_bounds = array<i64: 8, 1>}, {pipeline_mode = #tpu.pipeline_mode<synchronous>, transform_indices = @transform_2, window_bounds = array<i64: 8, 1>}, {transform_indices = @transform_3, window_bounds = array<i64: 1, 8, 256>}]} {
    %c0 = arith.constant 0 : index
    %c0_0 = arith.constant 0 : index
    %c0_1 = arith.constant 0 : index
    %0 = vector.load %arg2[%c0, %c0_0, %c0_1] : memref<1x8x256xf32, #tpu.memory_space<vmem>>, vector<1x8x256xf32>
    %1 = vector.shape_cast %0 : vector<1x8x256xf32> to vector<8x256xf32>
    %c0_2 = arith.constant 0 : index
    %c0_3 = arith.constant 0 : index
    %2 = vector.load %arg3[%c0_2, %c0_3] : memref<8x1xf32, #tpu.memory_space<vmem>>, vector<8x1xf32>
    %3 = vector.broadcast %2 : vector<8x1xf32> to vector<8x256xf32>
    %4 = arith.mulf %1, %3 : vector<8x256xf32>
    %c0_4 = arith.constant 0 : index
    %c0_5 = arith.constant 0 : index
    %5 = vector.load %arg4[%c0_4, %c0_5] : memref<8x1xf32, #tpu.memory_space<vmem>>, vector<8x1xf32>
    %6 = vector.broadcast %5 : vector<8x1xf32> to vector<8x256xf32>
    %7 = arith.addf %4, %6 : vector<8x256xf32>
    %cst = arith.constant 0.000000e+00 : f32
    %8 = vector.broadcast %cst : f32 to vector<8x256xf32>
    %9 = arith.cmpf oge, %7, %8 : vector<8x256xf32>
    %cst_6 = arith.constant 0.00999999977 : f32
    %10 = vector.broadcast %cst_6 : f32 to vector<8x256xf32>
    %11 = arith.mulf %10, %7 : vector<8x256xf32>
    %12 = arith.select %9, %7, %11 : vector<8x256xi1>, vector<8x256xf32>
    %c0_7 = arith.constant 0 : index
    %c0_8 = arith.constant 0 : index
    %c0_9 = arith.constant 0 : index
    %13 = vector.load %arg5[%c0_7, %c0_8, %c0_9] : memref<1x8x256xf32, #tpu.memory_space<vmem>>, vector<1x8x256xf32>
    %14 = vector.shape_cast %13 : vector<1x8x256xf32> to vector<8x256xf32>
    %15 = vector.shape_cast %12 : vector<8x256xf32> to vector<1x8x256xf32>
    tpu.vector_store %arg5[%c0_7, %c0_8, %c0_9], %15 {strides = array<i32>} : memref<1x8x256xf32, #tpu.memory_space<vmem>>, vector<1x8x256xf32>,
    return
  }
  func.func @transform_0(%arg0: i32, %arg1: i32) -> (i32, i32, i32) {
    %c0_i32 = arith.constant 0 : i32
    %c0_i32_0 = arith.constant 0 : i32
    return %arg0, %c0_i32, %arg1 : i32, i32, i32
  }
  func.func @transform_1(%arg0: i32, %arg1: i32) -> (i32, i32) {
    %c0_i32 = arith.constant 0 : i32
    %c0_i32_0 = arith.constant 0 : i32
    %c0_i32_1 = arith.constant 0 : i32
    return %c0_i32, %c0_i32_0 : i32, i32
  }
  func.func @transform_2(%arg0: i32, %arg1: i32) -> (i32, i32) {
    %c0_i32 = arith.constant 0 : i32
    %c0_i32_0 = arith.constant 0 : i32
    %c0_i32_1 = arith.constant 0 : i32
    return %c0_i32, %c0_i32_0 : i32, i32
  }
  func.func @transform_3(%arg0: i32, %arg1: i32) -> (i32, i32, i32) {
    %c0_i32 = arith.constant 0 : i32
    %c0_i32_0 = arith.constant 0 : i32
    return %arg0, %c0_i32, %arg1 : i32, i32, i32
  }
}

</mosaic_0001>

<bundles_post_ra>
// kernel: cbl_forward.3
= control target key start
LH: loop header
LB: loop body
LE: loop exit
PB: predicated region body
PF: predicated region fallthrough
CT: control target
= control target key end

     0   :  { %s407_s12 = smov 0   ;;  %s409_s13 = smov 0   ;;  %s446_s0 = inlined_call_operand.vmem [shape: f32[2,8,256], index: 0, kind: input, shape index: {}]   ;;  %s447_s1 = inlined_call_operand.vmem [shape: f32[8,1], index: 1, kind: input, shape index: {}]   ;;  %s448_s2 = inlined_call_operand.vmem [shape: f32[8,1], index: 2, kind: input, shape index: {}]   ;;  %s449_s3 = inlined_call_operand.vmem [shape: f32[2,8,256], index: 3, kind: output, shape index: {}]  }
   0x1   :  { %s411_s14 = smov 0  }
   0x2 LB: > { %s25_s15 = sadd.s32 1, %s380_s13  ;;  %p327_p0 = scmp.ge.s32.totalorder %s384_s14, 1  ;;  %s384_s14 = sphi %s411_s14, %s13_s14   ;;  %s380_s13 = sphi %s409_s13, %s451_s13   ;;  %s376_s12 = sphi %s407_s12, %s450_s12  }
   0x3   : > { %p27_p1 = scmp.ge.s32.totalorder %s25_s15, 2  ;;  %p158_p2 = scmp.lt.s32.totalorder %s384_s14, 3 }
   0x5   : > { %s453_s15 = smov (%p27_p1, %s25_s15), 0  ;;  %p159_p3 = pnand %p327_p0, %p158_p2 }
   0x6   : > { %v212_v0 = vld [vmem:[%s447_s1] sm:$0xff] (!%p159_p3)  ;;  %v386_v1 = vmov (!%p159_p3), 0   ;;  %p191_p4 = scmp.lt.s32.totalorder (!%p159_p3), %s376_s12, 1 }
   0x7   : > { %162 = sbr.rel (%p159_p3) target bundleno = 146 (0x92), region = 32  ;;  %361 = vset.pattern.permute.xlu0 (!%p159_p3), %v386_v1  ;;  %v220_v2 = vld [vmem:[%s448_s2] sm:$0xff] (!%p159_p3) }
   0x8   : > { %215 = vperm.xlu0 (!%p159_p3), %361, %v212_v0  }
   0xc   : > { %223 = vperm.xlu0 (!%p159_p3), %361, %v220_v2  }
   0xe   : > { %s455_s12 = smov (!%p191_p4, %s376_s12), 1 }
   0xf   : > { %s334_s20 = sshll.u32 %s455_s12, 4 }
  0x10   : > { %s198_s23 = scalar_lea.vmem %s446_s0, %s334_s20  ;;  %s208_s26 = scalar_lea.vmem %s449_s3, %s334_s20 }
  0x11   : > { %v210_v4 = vld [vmem:[%s198_s23] sm:$0xff]  ;;  %v211_v5 = vld [vmem:[%s198_s23 + $0x8] sm:$0xff] }
  0x87   : > { %v216_v3 = vpop.permute.xlu0 %215 }
  0x88   : > { %v218_v6 = vmul.f32 %v216_v3, %v210_v4  ;;  %v219_v7 = vmul.f32 %v216_v3, %v211_v5 }
  0x8b   : > { %v224_v8 = vpop.permute.xlu0 %223 }
  0x8c   : > { %v226_v9 = vadd.f32 %v224_v8, %v218_v6  ;;  %v227_v10 = vadd.f32 %v224_v8, %v219_v7 }
  0x8e   : > { %vm228_vm0 = vcmp.ge.f32.partialorder %v226_v9, 0.0  ;;  %vm229_vm1 = vcmp.ge.f32.partialorder %v227_v10, 0.0  ;;  %v230_v11 = vmul.f32 0.01, %v226_v9  ;;  %v231_v12 = vmul.f32 0.01, %v227_v10 }
  0x90   : > { %v232_v13 = vsel %vm228_vm0, %v226_v9, %v230_v11  ;;  %v233_v14 = vsel %vm229_vm1, %v227_v10, %v231_v12 }
  0x91   : > { %234 = vst [vmem:[%s208_s26] sm:$0xff] %v232_v13  ;;  %235 = vst [vmem:[%s208_s26 + $0x8] sm:$0xff] %v233_v14 }
  0x92 PF: > { %s13_s14 = sadd.s32 1, %s384_s14   ;;  %s450_s12 = smov %s380_s13 }
  0x93   : > { %p10_p5 = scmp.ge.s32.totalorder %s13_s14, 4   ;;  %s451_s13 = smov %s453_s15 }
  0x95   :  { %12 = sbr.rel (!%p10_p5) target bundleno = 2 (0x2), region = 62 }

// kernel: cbl_forward.2
= control target key start
LH: loop header
LB: loop body
LE: loop exit
PB: predicated region body
PF: predicated region fallthrough
CT: control target
= control target key end

     0   :  { %s2620_s15 = smov 0   ;;  %s2622_s16 = smov 0   ;;  %s3366_s0 = inlined_call_operand.vmem [shape: f32[2,4,24,18], index: 0, kind: input, shape index: {}, may-alias: {0,1}]   ;;  %s3367_s1 = inlined_call_operand.vmem [shape: f32[2,4,24,18], index: 1, kind: input, shape index: {}, may-alias: {0,1}]   ;;  %s3368_s2 = inlined_call_operand.vmem [shape: f32[9,8,4], index: 2, kind: input, shape index: {}]   ;;  %s3369_s3 = inlined_call_operand.vmem [shape: f32[2,8,256], index: 3, kind: output, shape index: {0}]   ;;  %s3370_s4 = inlined_call_operand.vmem [shape: f32[2,2,8,2], index: 4, kind: output, shape index: {1}]  }
   0x1   :  { %s2624_s17 = smov 0   ;;  %s2626_s18 = smov 0  }
   0x2   :  { %s2628_s19 = smov 0   ;;  %s2630_s20 = smov 0  }
   0x3   :  { %s2632_s21 = smov 0   ;;  %s2634_s22 = smov 0  }
   0x4   :  { %s2636_s23 = smov 0  }
   0x5 LB: > { %s24_s24 = sadd.s32 1, %s2572_s21  ;;  %s27_s25 = sadd.s32 1, %s2576_s22  ;;  %s2580_s23 = sphi %s2636_s23, %s15_s23   ;;  %s2576_s22 = sphi %s2634_s22, %s3380_s22   ;;  %s2572_s21 = sphi %s2632_s21, %s3379_s21   ;;  %s2568_s20 = sphi %s2630_s20, %s3378_s20   ;;  %s2564_s19 = sphi %s2628_s19, %s3377_s19   ;;  %s2560_s18 = sphi %s2626_s18, %s3376_s18   ;;  %s2556_s17 = sphi %s2624_s17, %s3375_s17   ;;  %s2552_s16 = sphi %s2622_s16, %s3374_s16   ;;  %s2548_s15 = sphi %s2620_s15, %s3373_s15  }
   0x6   : > { %p25_p0 = scmp.ge.s32.totalorder %s24_s24, 2  ;;  %p43_p1 = scmp.ne.s32.totalorder %s2560_s18, %s2556_s17 }
   0x7   : > { %p44_p2 = scmp.eq.s32.totalorder %s2580_s23, 0  ;;  %s36_s5 = sadd.s32 1, %s2560_s18 }
   0x8   : > { %s2670_s26 = scalar_select %p25_p0, 0, %s24_s24  }
   0x9   : > { %s3382_s25 = smov (!%p25_p0, %s27_s25), %s2576_s22  ;;  %p2675_p3 = por %p44_p2, %p43_p1 }
   0xa   : > { %p29_p4 = scmp.ge.s32.totalorder %s3382_s25, 2  ;;  %s60_s28 = sadd.s32 1, %s2670_s26 }
   0xb   : > { %s32_s29 = ssub.s32 %s2572_s21, %s2670_s26  ;;  %s62_s30 = ssub.s32 %s24_s24, %s60_s28 }
   0xc   : > { %s3384_s25 = smov (%p29_p4, %s3382_s25), 0  ;;  %p73_p5 = scmp.ne.s32.totalorder %s2552_s16, %s2548_s15 }
   0xd   : > { %s31_s6 = ssub.s32 %s2576_s22, %s3384_s25  ;;  %s66_s7 = sadd.s32 1, %s2552_s16 }
   0xe   : > { %s33_s8 = sor.u32 %s32_s29, %s31_s6  ;;  %s63_s9 = sor.u32 %s62_s30, %s31_s6 }
   0xf   : > { %p34_p6 = scmp.eq.s32.totalorder %s33_s8, 0  ;;  %p64_p7 = scmp.eq.s32.totalorder %s63_s9, 0 }
  0x10   : > { %p2692_p8 = por %p73_p5, %p44_p2  ;;  %p2298_p9 = scmp.ge.s32.totalorder %s2580_s23, 4 }
  0x11   : > { %s2697_s11 = scalar_select %p34_p6, %s2560_s18, %s36_s5  }
  0x12   : > { %s2700_s12 = scalar_select %p64_p7, %s2552_s16, %s66_s7  }
  0x13   : > { %179 = sbr.rel (%p2298_p9) target bundleno = 44 (0x2c), region = 20 }
  0x1a   : > { %182 = sbr.rel (!%p2675_p3) target bundleno = 35 (0x23), region = 24  ;;  %s184_s13 = sand.u32 (%p2675_p3), 1, %s2560_s18  }
  0x1b   : > { %s2420_s14 = smul.u32 (%p2675_p3), 12, %s2576_s22  ;;  %s2299_s24 = sshll.u32 (%p2675_p3), %s184_s13, 5 }
  0x1c   : > { %s186_s7 = scalar_lea.vmem (%p2675_p3), [#allocation2], %s2299_s24 }
  0x1d   : > { %s188_s28 = sadd.s32 (%p2675_p3), %s2572_s21, %s2420_s14 }
  0x1e   : > { %s2300_s29 = sshll.u32 (%p2675_p3), %s188_s28, 3 }
  0x1f   : > { %s190_s5 = scalar_lea.vmem (%p2675_p3), %s3366_s0, %s2300_s29 }
  0x20   : > { %v224_v0 = vld [vmem:[%s190_s5] sm:$0xff] (%p2675_p3)  ;;  %v226_v1 = vld [vmem:[%s190_s5 + $0x18] sm:$0xff] (%p2675_p3)  ;;  %v228_v2 = vld [vmem:[%s190_s5 + $0x30] sm:$0xff] (%p2675_p3) }
  0x21   : > { %225 = vst [vmem:[%s186_s7] sm:$0xff] %v224_v0  ;;  %227 = vst [vmem:[%s186_s7 + $0x8] sm:$0xff] %v226_v1  ;;  %v230_v3 = vld [vmem:[%s190_s5 + $0x48] sm:$0xff] }
  0x22   : > { %229 = vst [vmem:[%s186_s7 + $0x10] sm:$0xff] %v228_v2  ;;  %231 = vst [vmem:[%s186_s7 + $0x18] sm:$0xff] %v230_v3 }
  0x23 PF: > { %237 = sbr.rel (!%p2692_p8) target bundleno = 44 (0x2c), region = 62  ;;  %s239_s27 = sand.u32 (%p2692_p8), 1, %s2552_s16  }
  0x24   : > { %s2196_s8 = smul.u32 (%p2692_p8), 12, %s2576_s22  ;;  %s2301_s9 = sshll.u32 (%p2692_p8), %s239_s27, 5 }
  0x25   : > { %s241_s30 = scalar_lea.vmem (%p2692_p8), [#allocation3], %s2301_s9 }
  0x26   : > { %s2197_s13 = sadd.s32 (%p2692_p8), %s2572_s21, %s2196_s8 }
  0x27   : > { %s2302_s14 = sshll.u32 (%p2692_p8), %s2197_s13, 3 }
  0x28   : > { %s2199_s24 = scalar_lea.vmem (%p2692_p8), %s3367_s1, %s2302_s14 }
  0x29   : > { %v2303_v4 = vld [vmem:[%s2199_s24 + $0x8] sm:$0xff] (%p2692_p8)  ;;  %v2304_v5 = vld [vmem:[%s2199_s24 + $0x20] sm:$0xff] (%p2692_p8)  ;;  %v2305_v6 = vld [vmem:[%s2199_s24 + $0x38] sm:$0xff] (%p2692_p8) }
  0x2a   : > { %281 = vst [vmem:[%s241_s30] sm:$0xff] %v2303_v4  ;;  %283 = vst [vmem:[%s241_s30 + $0x8] sm:$0xff] %v2304_v5  ;;  %v2306_v7 = vld [vmem:[%s2199_s24 + $0x50] sm:$0xff] }
  0x2b   : > { %285 = vst [vmem:[%s241_s30 + $0x10] sm:$0xff] %v2305_v6  ;;  %287 = vst [vmem:[%s241_s30 + $0x18] sm:$0xff] %v2306_v7 }
  0x2c PF: > { %p2307_p10 = scmp.ge.s32.totalorder %s2580_s23, 1  ;;  %p292_p11 = scmp.lt.s32.totalorder %s2580_s23, 5 }
  0x2e   : > { %p293_p12 = pnand %p2307_p10, %p292_p11 }
  0x2f   : > { %s299_s10 = sand.u32 (!%p293_p12), 1, %s2556_s17   ;;  %s306_s6 = sand.u32 (!%p293_p12), 1, %s2548_s15   ;;  %v2582_v8 = vmov (!%p293_p12), 0.0   ;;  %vm955_vm0 = vcmask (!%p293_p12), 1046528   ;;  %v2585_v33 = vmov (!%p293_p12), 1983009808   ;;  %v376_v35 = vlaneseq (!%p293_p12) }
  0x30   : > { %296 = sbr.rel (%p293_p12) target bundleno = 775 (0x307), region = 100  ;;  %s2308_s5 = sshll.u32 (!%p293_p12), %s299_s10, 5  ;;  %2360 = vmatprep.subr.mxu1 (!%p293_p12), %v2582_v8  ;;  %2380 = vmatprep.subr.mxu0 (!%p293_p12), %v2582_v8  ;;  %v374_v34 = vunpack.c.l.s4 (!%p293_p12), %v2585_v33  ;;  %vm1542_vm1 = vcmask (!%p293_p12), 1045504   ;;  %v2586_v55 = vmov (!%p293_p12), 1934713408   ;;  %vm467_vm2 = vcmask (!%p293_p12), 130048  }
  0x31   : > { %s2309_s7 = sshll.u32 (!%p293_p12), %s306_s6, 5  ;;  %s301_s27 = scalar_lea.vmem (!%p293_p12), [#allocation2], %s2308_s5  ;;  %v377_v45 = vshrl.u32 (!%p293_p12), %v376_v35, 7  ;;  %v406_v56 = vunpack.c.l.s4 (!%p293_p12), %v2586_v55  ;;  %vm2594_vm3 = vmmov (!%p293_p12), 0   ;;  %vm469_vm4 = vcmask (!%p293_p12), 261120  }
  0x32   : > { %v2725_v9 = vld [vmem:[%s301_s27 + $0x10] sm:$0xff] (!%p293_p12)  ;;  %s308_s8 = scalar_lea.vmem (!%p293_p12), [#allocation3], %s2309_s7  ;;  %v2727_v11 = vld [vmem:[%s301_s27] sm:$0xff] (!%p293_p12)  ;;  %v2731_v16 = vld [vmem:[%s301_s27 + $0x18] sm:$0xff] (!%p293_p12)  ;;  %s2583_s15 = smov (!%p293_p12), 127   ;;  %v375_v44 = vunpack.c.0.s8 (!%p293_p12), %v374_v34  ;;  %2362 = vmatprep.mubr.msk.f32.mxu1 (!%p293_p12), %vm2594_vm3, %v2582_v8  ;;  %2382 = vmatprep.mubr.msk.f32.mxu0 (!%p293_p12), %vm2594_vm3, %v2582_v8  ;;  %vm471_vm5 = vcmask (!%p293_p12), 392192  }
  0x33   : > { %v369_v10 = vld [vmem:[%s308_s8 + $0x10] sm:$0x3] (!%p293_p12)  ;;  %v962_v12 = vrot.slane (!%p293_p12), %v2725_v9, 1  ;;  %v367_v14 = vld [vmem:[%s308_s8] sm:$0x3] (!%p293_p12)  ;;  %v956_v15 = vrot.slane (!%p293_p12), %v2727_v11, 1  ;;  %v371_v50 = vcombine.low (!%p293_p12), %v2727_v11, %v2725_v9  ;;  %v407_v61 = vunpack.c.0.s8 (!%p293_p12), %v406_v56 }
  0x34   : > { %v963_v13 = vrot.slane (!%p293_p12), %v369_v10, 1  ;;  %v957_v17 = vrot.slane (!%p293_p12), %v367_v14, 1  ;;  %v370_v18 = vld [vmem:[%s308_s8 + $0x18] sm:$0x3] (!%p293_p12)  ;;  %v965_v19 = vrot.slane (!%p293_p12), %v2731_v16, 1  ;;  %v2734_v20 = vld [vmem:[%s301_s27 + $0x8] sm:$0xff] (!%p293_p12)  ;;  %v2799_v52 = vsub.s32 (!%p293_p12), %v375_v44, %v377_v45 }
  0x35   : > { %v966_v22 = vrot.slane (!%p293_p12), %v370_v18, 1  ;;  %v368_v23 = vld [vmem:[%s308_s8 + $0x8] sm:$0x3] (!%p293_p12)  ;;  %v959_v24 = vrot.slane (!%p293_p12), %v2734_v20, 1  ;;  %s2584_s17 = smov (!%p293_p12), 126   ;;  %v1546_v36 = vrot.slane (!%p293_p12), %v2734_v20, 2  ;;  %v387_v51 = vcombine.low (!%p293_p12), %v2734_v20, %v2731_v16 }
  0x36   : > { %v2737_v21 = vsel (!%p293_p12), %vm955_vm0, %v962_v12, %v963_v13  ;;  %v2743_v25 = vsel (!%p293_p12), %vm955_vm0, %v956_v15, %v957_v17  ;;  %v960_v26 = vrot.slane (!%p293_p12), %v368_v23, 1  ;;  %v1547_v37 = vrot.slane (!%p293_p12), %v368_v23, 2  ;;  %s2587_s9 = smov (!%p293_p12), 16   ;;  %s2588_s13 = smov (!%p293_p12), 32  }
  0x37   : > { %1158 = vrot.lane.b32.xlu1 %v2737_v21, %s2583_s15  ;;  %1154 = vrot.lane.b32.xlu0 %v2743_v25, %s2583_s15  ;;  %v972_v27 = vcombine.low %v2743_v25, %v2737_v21  ;;  %v973_v28 = vcombine.high %v2743_v25, %v2737_v21  ;;  %v2752_v29 = vsel %vm955_vm0, %v965_v19, %v966_v22  ;;  %v1543_v38 = vrot.slane %v2727_v11, 2  ;;  %s2589_s14 = smov 48   ;;  %s2590_s28 = smov 64  }
  0x38   : > { %v2755_v30 = vsel %vm955_vm0, %v959_v24, %v960_v26  ;;  %v1544_v39 = vrot.slane %v367_v14, 2  ;;  %v1552_v40 = vrot.slane %v2731_v16, 2  ;;  %v1553_v41 = vrot.slane %v370_v18, 2  ;;  %s2591_s29 = smov 80   ;;  %s2592_s24 = smov 96  }
  0x39   : > { %v988_v31 = vcombine.low %v2755_v30, %v2752_v29  ;;  %v989_v32 = vcombine.high %v2755_v30, %v2752_v29  ;;  %v1549_v42 = vrot.slane %v2725_v9, 2  ;;  %v1550_v43 = vrot.slane %v369_v10, 2  ;;  %s2593_s30 = smov 112   ;;  %p347_p13 = scmp.lt.s32.totalorder %s2568_s20, 1 }
  0x3a   : > { %v1548_v46 = vsel %vm1542_vm1, %v1546_v36, %v1547_v37  ;;  %v1545_v47 = vsel %vm1542_vm1, %v1543_v38, %v1544_v39  ;;  %v1554_v48 = vsel %vm1542_vm1, %v1552_v40, %v1553_v41  ;;  %v379_v57 = vrot.slane %v371_v50, %v2799_v52  ;;  %p349_p0 = scmp.lt.s32.totalorder %s2564_s19, 1 }
  0x3b   : > { %1160 = vrot.lane.b32.xlu1 %v2752_v29, %s2583_s15  ;;  %1156 = vrot.lane.b32.xlu0 %v2755_v30, %s2583_s15  ;;  %v1551_v49 = vsel %vm1542_vm1, %v1549_v42, %v1550_v43  ;;  %v1575_v53 = vcombine.low %v1548_v46, %v1554_v48  ;;  %v395_v58 = vrot.slane %v387_v51, %v2799_v52  ;;  %vm473_vm6 = vcmask 523264   ;;  %s3386_s20 = smov (!%p347_p13, %s2568_s20), 1 }
  0x3c   : > { %v1559_v54 = vcombine.low %v1545_v47, %v1551_v49  ;;  %v2811_v63 = vsub.s32 %v407_v61, %v377_v45  ;;  %v372_v5 = vcombine.high %v2727_v11, %v2725_v9  ;;  %v388_v6 = vcombine.high %v2734_v20, %v2731_v16  ;;  %s3388_s19 = smov (!%p349_p0, %s2564_s19), 1  ;;  %s2310_s7 = sshll.u32 %s3386_s20, 1 }
  0x3d   : > { %v1583_v59 = vrot.slane %v1575_v53, %v2799_v52  ;;  %v403_v62 = vcombine.low %v379_v57, %v395_v58  ;;  %v404_v4 = vcombine.high %v379_v57, %v395_v58  ;;  %v1576_v7 = vcombine.high %v1548_v46, %v1554_v48  ;;  %s352_s27 = sadd.s32 %s2310_s7, %s3388_s19 }
  0x3e   : > { %v1567_v60 = vrot.slane %v1559_v54, %v2799_v52  ;;  %v1560_v10 = vcombine.high %v1545_v47, %v1551_v49  ;;  %v386_v15 = vrot.slane %v372_v5, %v2799_v52  ;;  %v2863_v40 = vrot.slane %v972_v27, %v2799_v52  ;;  %s2311_s8 = sshll.u32 %s352_s27, 3 }
  0x3f   : > { %488 = vrot.lane.b32.xlu1 %v2734_v20, %s2583_s15  ;;  %486 = vrot.lane.b32.xlu0 %v2727_v11, %s2583_s15  ;;  %v2815_v1 = vrot.slane %v403_v62, %v2811_v63  ;;  %v418_v14 = vrot.slane %v404_v4, %v2811_v63  ;;  %v1590_v17 = vrot.slane %v1576_v7, %v2799_v52  ;;  %vm475_vm7 = vcmask 654336  }
  0x40   : > { %v1591_v0 = vcombine.low %v1567_v60, %v1583_v59  ;;  %v1592_v13 = vcombine.high %v1567_v60, %v1583_v59  ;;  %v2869_v41 = vrot.slane %v988_v31, %v2799_v52  ;;  %v2881_v27 = vrot.slane %v973_v28, %v2799_v52 }
  0x41   : > { %v435_v3 = vcombine.high %v2815_v1, %v2582_v8  ;;  %v436_v18 = vcombine.high %v418_v14, %v2582_v8  ;;  %v2887_v31 = vrot.slane %v989_v32, %v2799_v52  ;;  %vm477_vm8 = vcmask 785408  }
  0x42   : > { %v2819_v2 = vrot.slane %v1591_v0, %v2811_v63  ;;  %v1004_v42 = vcombine.low %v2863_v40, %v2869_v41  ;;  %v1005_v43 = vcombine.high %v2863_v40, %v2869_v41  ;;  %vm607_vm9 = vcmask 1043456  }
  0x43   : > { %492 = vrot.lane.b32.xlu1 %v2731_v16, %s2583_s15  ;;  %490 = vrot.lane.b32.xlu0 %v2725_v9, %s2583_s15  ;;  %v1020_v44 = vcombine.low %v2881_v27, %v2887_v31  ;;  %v1021_v45 = vcombine.high %v2881_v27, %v2887_v31  ;;  %vm479_vm10 = vcmask 916480   ;;  %vm603_vm11 = vcmask 31744  }
  0x44   : > { %v1623_v12 = vcombine.high %v2819_v2, %v2582_v8  ;;  %vm2135_vm12 = vcmask 7168   ;;  %vm2137_vm13 = vcmask 15360  }
  0x45   : > { %v1028_v40 = vrot.slane %v1020_v44, %v2811_v63 }
  0x47   : > { %1350 = vrot.lane.b32.xlu1 %v2755_v30, %s2584_s17  ;;  %1348 = vrot.lane.b32.xlu0 %v2743_v25, %s2584_s17 }
  0x4b   : > { %1354 = vrot.lane.b32.xlu1 %v2752_v29, %s2584_s17  ;;  %1352 = vrot.lane.b32.xlu0 %v2737_v21, %s2584_s17 }
  0x4f   : > { %759 = vrot.lane.b32.xlu1 %v2734_v20, %s2584_s17  ;;  %757 = vrot.lane.b32.xlu0 %v2727_v11, %s2584_s17  ;;  %v1606_v11 = vrot.slane %v1592_v13, %v2811_v63 }
  0x51   : > { %v1624_v20 = vcombine.high %v1606_v11, %v2582_v8 }
  0x53   : > { %763 = vrot.lane.b32.xlu1 %v2731_v16, %s2584_s17  ;;  %761 = vrot.lane.b32.xlu0 %v2725_v9, %s2584_s17  ;;  %v402_v9 = vrot.slane %v388_v6, %v2799_v52  ;;  %v1574_v16 = vrot.slane %v1560_v10, %v2799_v52 }
  0x55   : > { %v419_v19 = vcombine.low %v386_v15, %v402_v9  ;;  %v1607_v22 = vcombine.low %v1574_v16, %v1590_v17  ;;  %v420_v33 = vcombine.high %v386_v15, %v402_v9  ;;  %v1608_v35 = vcombine.high %v1574_v16, %v1590_v17 }
  0x57   : > { %1743 = vrot.lane.b32.xlu1 %v1548_v46, %s2583_s15  ;;  %1741 = vrot.lane.b32.xlu0 %v1545_v47, %s2583_s15  ;;  %v427_v23 = vrot.slane %v419_v19, %v2811_v63  ;;  %v1615_v24 = vrot.slane %v1607_v22, %v2811_v63  ;;  %v434_v36 = vrot.slane %v420_v33, %v2811_v63 }
  0x58   : > { %v1622_v37 = vrot.slane %v1608_v35, %v2811_v63 }
  0x59   : > { %v437_v26 = vcombine.high %v427_v23, %v2582_v8  ;;  %v1625_v34 = vcombine.high %v1615_v24, %v2582_v8  ;;  %v438_v38 = vcombine.high %v434_v36, %v2582_v8 }
  0x5a   : > { %v1626_v39 = vcombine.high %v1622_v37, %v2582_v8 }
  0x5b   : > { %1747 = vrot.lane.b32.xlu1 %v1554_v48, %s2583_s15  ;;  %1745 = vrot.lane.b32.xlu0 %v1551_v49, %s2583_s15 }
  0x5f   : > { %1937 = vrot.lane.b32.xlu1 %v1548_v46, %s2584_s17  ;;  %1935 = vrot.lane.b32.xlu0 %v1545_v47, %s2584_s17 }
  0x63   : > { %1941 = vrot.lane.b32.xlu1 %v1554_v48, %s2584_s17  ;;  %1939 = vrot.lane.b32.xlu0 %v1551_v49, %s2584_s17 }
  0x67   : > { %440 = vrot.lane.b32.xlu1 %v435_v3, %s2587_s9  ;;  %1628 = vrot.lane.b32.xlu0 %v1623_v12, %s2587_s9 }
  0x6b   : > { %444 = vrot.lane.b32.xlu1 %v418_v14, %s2588_s13  ;;  %1632 = vrot.lane.b32.xlu0 %v1606_v11, %s2588_s13 }
  0x6f   : > { %448 = vrot.lane.b32.xlu1 %v436_v18, %s2589_s14  ;;  %1636 = vrot.lane.b32.xlu0 %v1624_v20, %s2589_s14 }
  0x73   : > { %452 = vrot.lane.b32.xlu1 %v427_v23, %s2590_s28  ;;  %1640 = vrot.lane.b32.xlu0 %v1615_v24, %s2590_s28 }
  0x77   : > { %456 = vrot.lane.b32.xlu1 %v437_v26, %s2591_s29  ;;  %1644 = vrot.lane.b32.xlu0 %v1625_v34, %s2591_s29 }
  0x7b   : > { %460 = vrot.lane.b32.xlu1 %v434_v36, %s2592_s24  ;;  %1648 = vrot.lane.b32.xlu0 %v1622_v37, %s2592_s24 }
  0x7f   : > { %464 = vrot.lane.b32.xlu1 %v438_v38, %s2593_s30  ;;  %1652 = vrot.lane.b32.xlu0 %v1626_v39, %s2593_s30 }
  0xa9   : > { %v2893_v46 = vpop.permute.xlu1 %1158  ;;  %v2895_v47 = vpop.permute.xlu0 %1154 }
  0xad   : > { %v2897_v48 = vpop.permute.xlu1 %1160  ;;  %v2899_v21 = vpop.permute.xlu0 %1156 }
  0xb1   : > { %v489_v25 = vpop.permute.xlu1 %488  ;;  %v487_v28 = vpop.permute.xlu0 %486 }
  0xb5   : > { %v493_v49 = vpop.permute.xlu1 %492  ;;  %v491_v32 = vpop.permute.xlu0 %490 }
  0xb6   : > { %v514_v29 = vcombine.low %v489_v25, %v493_v49  ;;  %v515_v30 = vcombine.high %v489_v25, %v493_v49  ;;  %v498_v50 = vcombine.low %v487_v28, %v491_v32  ;;  %v499_v51 = vcombine.high %v487_v28, %v491_v32 }
  0xb8   : > { %v2902_v53 = vrot.slane %v514_v29, %v2799_v52  ;;  %v529_v54 = vrot.slane %v515_v30, %v2799_v52  ;;  %v506_v55 = vrot.slane %v498_v50, %v2799_v52  ;;  %v513_v56 = vrot.slane %v499_v51, %v2799_v52 }
  0xb9   : > { %v1351_v57 = vpop.permute.xlu1 %1350  ;;  %v1349_v58 = vpop.permute.xlu0 %1348  ;;  %v1182_v29 = vcombine.low %v2899_v21, %v2897_v48 }
  0xba   : > { %v531_v59 = vcombine.high %v506_v55, %v2902_v53  ;;  %v546_v60 = vcombine.low %v513_v56, %v529_v54  ;;  %v547_v7 = vcombine.high %v513_v56, %v529_v54  ;;  %v530_v30 = vcombine.low %v506_v55, %v2902_v53 }
  0xbb   : > { %v1190_v53 = vrot.slane %v1182_v29, %v2799_v52 }
  0xbc   : > { %v2909_v62 = vrot.slane %v531_v59, %v2811_v63  ;;  %v2922_v9 = vrot.slane %v546_v60, %v2811_v63  ;;  %v2932_v20 = vrot.slane %v547_v7, %v2811_v63  ;;  %v1166_v59 = vcombine.low %v2895_v47, %v2893_v46 }
  0xbd   : > { %v1355_v61 = vpop.permute.xlu1 %1354  ;;  %v1353_v4 = vpop.permute.xlu0 %1352 }
  0xbe   : > { %v1376_v0 = vcombine.low %v1351_v57, %v1355_v61  ;;  %v1377_v3 = vcombine.high %v1351_v57, %v1355_v61  ;;  %v1360_v5 = vcombine.low %v1349_v58, %v1353_v4  ;;  %v1361_v6 = vcombine.high %v1349_v58, %v1353_v4  ;;  %571 = vrot.lane.b32.xlu1 %v2909_v62, %s2588_s13 }
  0xc0   : > { %v2914_v10 = vrot.slane %v1376_v0, %v2799_v52  ;;  %v1391_v12 = vrot.slane %v1377_v3, %v2799_v52  ;;  %v2918_v13 = vrot.slane %v1360_v5, %v2799_v52  ;;  %v1375_v14 = vrot.slane %v1361_v6, %v2799_v52 }
  0xc1   : > { %v760_v15 = vpop.permute.xlu1 %759  ;;  %v758_v11 = vpop.permute.xlu0 %757  ;;  %v2979_v0 = vrot.slane %v530_v30, %v2811_v63 }
  0xc2   : > { %v1393_v16 = vcombine.high %v2918_v13, %v2914_v10  ;;  %579 = vrot.lane.b32.xlu1 %v2922_v9, %s2590_s28  ;;  %v1408_v17 = vcombine.low %v1375_v14, %v1391_v12  ;;  %v1409_v34 = vcombine.high %v1375_v14, %v1391_v12  ;;  %v1174_v12 = vrot.slane %v1166_v59, %v2799_v52 }
  0xc4   : > { %v2929_v19 = vrot.slane %v1393_v16, %v2811_v63  ;;  %v2951_v25 = vrot.slane %v1408_v17, %v2811_v63  ;;  %v2963_v51 = vrot.slane %v1409_v34, %v2811_v63 }
  0xc5   : > { %v764_v18 = vpop.permute.xlu1 %763  ;;  %v762_v24 = vpop.permute.xlu0 %761 }
  0xc6   : > { %v785_v22 = vcombine.low %v760_v15, %v764_v18  ;;  %v786_v23 = vcombine.high %v760_v15, %v764_v18  ;;  %v769_v26 = vcombine.low %v758_v11, %v762_v24  ;;  %v770_v33 = vcombine.high %v758_v11, %v762_v24  ;;  %1433 = vrot.lane.b32.xlu0 %v2929_v19, %s2588_s13 }
  0xc7   : > { %587 = vrot.lane.b32.xlu1 %v2932_v20, %s2592_s24  ;;  %v1183_v15 = vcombine.high %v2899_v21, %v2897_v48  ;;  %v1198_v11 = vcombine.low %v1174_v12, %v1190_v53  ;;  %v562_v18 = vcombine.high %v2979_v0, %v2582_v8  ;;  %v1199_v21 = vcombine.high %v1174_v12, %v1190_v53 }
  0xc8   : > { %v2939_v35 = vrot.slane %v785_v22, %v2799_v52  ;;  %v2942_v36 = vrot.slane %v786_v23, %v2799_v52  ;;  %v2945_v37 = vrot.slane %v769_v26, %v2799_v52  ;;  %v2948_v38 = vrot.slane %v770_v33, %v2799_v52 }
  0xc9   : > { %v1744_v39 = vpop.permute.xlu1 %1743  ;;  %v1742_v28 = vpop.permute.xlu0 %1741  ;;  %v1167_v22 = vcombine.high %v2895_v47, %v2893_v46  ;;  %v1197_v48 = vrot.slane %v1183_v15, %v2799_v52  ;;  %v563_v46 = vcombine.high %v2909_v62, %v2582_v8  ;;  %v3025_v47 = vrot.slane %v1198_v11, %v2811_v63 }
  0xca   : > { %v802_v49 = vcombine.high %v2945_v37, %v2939_v35  ;;  %1441 = vrot.lane.b32.xlu0 %v2951_v25, %s2590_s28  ;;  %v817_v32 = vcombine.low %v2948_v38, %v2942_v36  ;;  %v801_v62 = vcombine.low %v2945_v37, %v2939_v35  ;;  %v1213_v29 = vrot.slane %v1199_v21, %v2811_v63 }
  0xcb   : > { %v1181_v26 = vrot.slane %v1167_v22, %v2799_v52  ;;  %v565_v35 = vcombine.high %v2932_v20, %v2582_v8 }
  0xcc   : > { %v2966_v54 = vrot.slane %v802_v49, %v2811_v63  ;;  %v2991_v6 = vrot.slane %v817_v32, %v2811_v63  ;;  %v564_v49 = vcombine.high %v2922_v9, %v2582_v8  ;;  %v3050_v9 = vrot.slane %v801_v62, %v2811_v63 }
  0xcd   : > { %v1748_v50 = vpop.permute.xlu1 %1747  ;;  %v1746_v58 = vpop.permute.xlu0 %1745  ;;  %v1214_v34 = vcombine.low %v1181_v26, %v1197_v48  ;;  %v1019_v62 = vrot.slane %v1005_v43, %v2811_v63 }
  0xce   : > { %v1769_v56 = vcombine.low %v1744_v39, %v1748_v50  ;;  %v1770_v57 = vcombine.high %v1744_v39, %v1748_v50  ;;  %v1753_v60 = vcombine.low %v1742_v28, %v1746_v58  ;;  %v1754_v61 = vcombine.high %v1742_v28, %v1746_v58  ;;  %1449 = vrot.lane.b32.xlu0 %v2963_v51, %s2592_s24 }
  0xcf   : > { %842 = vrot.lane.b32.xlu1 %v2966_v54, %s2588_s13  ;;  %v1230_v28 = vcombine.high %v3025_v47, %v2582_v8  ;;  %v1231_v50 = vcombine.high %v1213_v29, %v2582_v8  ;;  %v1222_v37 = vrot.slane %v1214_v34, %v2811_v63  ;;  %v1392_v58 = vcombine.low %v2918_v13, %v2914_v10 }
  0xd0   : > { %v2976_v55 = vrot.slane %v1769_v56, %v2799_v52  ;;  %v2982_v3 = vrot.slane %v1770_v57, %v2799_v52  ;;  %v2985_v4 = vrot.slane %v1753_v60, %v2799_v52  ;;  %v2988_v5 = vrot.slane %v1754_v61, %v2799_v52 }
  0xd1   : > { %v2993_v7 = vpop.permute.xlu0 %1935  ;;  %v1232_v59 = vcombine.high %v1222_v37, %v2582_v8  ;;  %v833_v20 = vcombine.high %v3050_v9, %v2582_v8  ;;  %v834_v10 = vcombine.high %v2966_v54, %v2582_v8  ;;  %v3068_v13 = vrot.slane %v1392_v58, %v2811_v63  ;;  %v1938_v22 = vpop.permute.xlu1 %1937 }
  0xd2   : > { %v1786_v14 = vcombine.high %v2985_v4, %v2976_v55  ;;  %v1801_v16 = vcombine.low %v2988_v5, %v2982_v3  ;;  %v1425_v54 = vcombine.high %v2929_v19, %v2582_v8  ;;  %v1427_v19 = vcombine.high %v2963_v51, %v2582_v8 }
  0xd3   : > { %850 = vrot.lane.b32.xlu1 %v2991_v6, %s2590_s28  ;;  %v1424_v11 = vcombine.high %v3068_v13, %v2582_v8  ;;  %v835_v21 = vcombine.high %v2991_v6, %v2582_v8 }
  0xd4   : > { %v3005_v17 = vrot.slane %v1786_v14, %v2811_v63  ;;  %v3020_v24 = vrot.slane %v1801_v16, %v2811_v63  ;;  %v1785_v16 = vcombine.low %v2985_v4, %v2976_v55 }
  0xd5   : > { %v3011_v23 = vpop.permute.xlu0 %1939  ;;  %v1942_v4 = vpop.permute.xlu1 %1941 }
  0xd6   : > { %1826 = vrot.lane.b32.xlu0 %v3005_v17, %s2588_s13  ;;  %v1963_v6 = vcombine.low %v1938_v22, %v1942_v4  ;;  %v1964_v43 = vcombine.high %v1938_v22, %v1942_v4 }
  0xd7   : > { %567 = vrot.lane.b32.xlu1 %v562_v18, %s2587_s9  ;;  %v1426_v18 = vcombine.high %v2951_v25, %v2582_v8 }
  0xd8   : > { %v1971_v34 = vrot.slane %v1963_v6, %v2799_v52 }
  0xd9   : > { %v1629_v33 = vpop.permute.xlu0 %1628 }
  0xda   : > { %1834 = vrot.lane.b32.xlu0 %v3020_v24, %s2590_s28  ;;  %v1655_v39 = vsel %vm467_vm2, %v2819_v2, %v1629_v33  ;;  %v1215_v2 = vcombine.high %v1181_v26, %v1197_v48  ;;  %v818_v48 = vcombine.high %v2948_v38, %v2942_v36  ;;  %v3109_v36 = vrot.slane %v1004_v42, %v2811_v63 }
  0xdb   : > { %575 = vrot.lane.b32.xlu1 %v563_v46, %s2589_s14  ;;  %v3096_v46 = vrot.slane %v1785_v16, %v2811_v63  ;;  %v1818_v38 = vcombine.high %v3005_v17, %v2582_v8  ;;  %v1947_v26 = vcombine.low %v2993_v7, %v3011_v23  ;;  %v1802_v42 = vcombine.high %v2988_v5, %v2982_v3  ;;  %v441_v3 = vpop.permute.xlu1 %440 }
  0xdc   : > { %v1229_v60 = vrot.slane %v1215_v2, %v2811_v63  ;;  %v832_v55 = vrot.slane %v818_v48, %v2811_v63  ;;  %v1036_v33 = vcombine.high %v3109_v36, %v2582_v8  ;;  %v1037_v5 = vcombine.high %v1019_v62, %v2582_v8 }
  0xdd   : > { %v1633_v30 = vpop.permute.xlu0 %1632  ;;  %v1817_v25 = vcombine.high %v3096_v46, %v2582_v8  ;;  %v1955_v17 = vrot.slane %v1947_v26, %v2799_v52 }
  0xde   : > { %1235 = vrot.lane.b32.xlu0 %v1230_v28, %s2587_s9  ;;  %v1656_v32 = vsel %vm469_vm4, %v1655_v39, %v1633_v30  ;;  %v1233_v12 = vcombine.high %v1229_v60, %v2582_v8  ;;  %v836_v51 = vcombine.high %v832_v55, %v2582_v8  ;;  %v1819_v39 = vcombine.high %v3020_v24, %v2582_v8 }
  0xdf   : > { %583 = vrot.lane.b32.xlu1 %v564_v49, %s2591_s29  ;;  %v1979_v28 = vcombine.low %v1955_v17, %v1971_v34  ;;  %v1816_v49 = vrot.slane %v1802_v42, %v2811_v63  ;;  %v445_v41 = vpop.permute.xlu1 %444  ;;  %v1948_v30 = vcombine.high %v2993_v7, %v3011_v23  ;;  %v1035_v7 = vrot.slane %v1021_v45, %v2811_v63 }
  0xe1   : > { %v1637_v56 = vpop.permute.xlu0 %1636  ;;  %v1820_v24 = vcombine.high %v1816_v49, %v2582_v8 }
  0xe2   : > { %1243 = vrot.lane.b32.xlu0 %v1231_v50, %s2589_s14  ;;  %v1657_v57 = vsel %vm471_vm5, %v1656_v32, %v1637_v56  ;;  %v1980_v32 = vcombine.high %v1955_v17, %v1971_v34  ;;  %v1038_v50 = vcombine.high %v1028_v40, %v2582_v8 }
  0xe3   : > { %591 = vrot.lane.b32.xlu1 %v565_v35, %s2593_s30  ;;  %v1978_v35 = vrot.slane %v1964_v43, %v2799_v52  ;;  %v449_v56 = vpop.permute.xlu1 %448 }
  0xe4   : > { %v1994_v44 = vrot.slane %v1980_v32, %v2811_v63 }
  0xe5   : > { %v1641_v61 = vpop.permute.xlu0 %1640 }
  0xe6   : > { %1251 = vrot.lane.b32.xlu0 %v1232_v59, %s2591_s29  ;;  %v1658_v53 = vsel %vm473_vm6, %v1657_v57, %v1641_v61  ;;  %v2012_v57 = vcombine.high %v1994_v44, %v2582_v8 }
  0xe7   : > { %838 = vrot.lane.b32.xlu1 %v833_v20, %s2587_s9  ;;  %v453_v58 = vpop.permute.xlu1 %452 }
  0xe9   : > { %v1645_v14 = vpop.permute.xlu0 %1644 }
  0xea   : > { %1259 = vrot.lane.b32.xlu0 %v1233_v12, %s2593_s30  ;;  %v3073_v15 = vsel %vm475_vm7, %v1658_v53, %v1645_v14 }
  0xeb   : > { %846 = vrot.lane.b32.xlu1 %v834_v10, %s2589_s14  ;;  %v457_v31 = vpop.permute.xlu1 %456 }
  0xed   : > { %v3175_v12 = vpop.permute.xlu0 %1648 }
  0xee   : > { %1429 = vrot.lane.b32.xlu0 %v1424_v11, %s2587_s9 }
  0xef   : > { %1239 = vrot.lane.b32.xlu1 %v1213_v29, %s2588_s13  ;;  %v3138_v29 = vrot.slane %v1979_v28, %v2811_v63 }
  0xf1   : > { %v2011_v2 = vcombine.high %v3138_v29, %v2582_v8  ;;  %v3177_v14 = vpop.permute.xlu0 %1652 }
  0xf2   : > { %1437 = vrot.lane.b32.xlu0 %v1425_v54, %s2589_s14 }
  0xf3   : > { %1247 = vrot.lane.b32.xlu1 %v1222_v37, %s2590_s28  ;;  %v1962_v37 = vrot.slane %v1948_v30, %v2799_v52  ;;  %v1039_v52 = vcombine.high %v1035_v7, %v2582_v8 }
  0xf5   : > { %v1995_v23 = vcombine.low %v1962_v37, %v1978_v35  ;;  %v1996_v20 = vcombine.high %v1962_v37, %v1978_v35 }
  0xf6   : > { %1445 = vrot.lane.b32.xlu0 %v1426_v18, %s2591_s29 }
  0xf7   : > { %1255 = vrot.lane.b32.xlu1 %v1229_v60, %s2592_s24  ;;  %v2003_v59 = vrot.slane %v1995_v23, %v2811_v63  ;;  %v2010_v45 = vrot.slane %v1996_v20, %v2811_v63  ;;  %v461_v60 = vpop.permute.xlu1 %460 }
  0xf9   : > { %v2013_v27 = vcombine.high %v2003_v59, %v2582_v8  ;;  %v2014_v61 = vcombine.high %v2010_v45, %v2582_v8 }
  0xfa   : > { %1453 = vrot.lane.b32.xlu0 %v1427_v19, %s2593_s30  ;;  %v468_v19 = vsel %vm467_vm2, %v2815_v1, %v441_v3 }
  0xfb   : > { %854 = vrot.lane.b32.xlu1 %v835_v21, %s2591_s29  ;;  %v465_v53 = vpop.permute.xlu1 %464  ;;  %v470_v21 = vsel %vm469_vm4, %v468_v19, %v445_v41 }
  0xfe   : > { %1822 = vrot.lane.b32.xlu0 %v1817_v25, %s2587_s9 }
  0xff   : > { %858 = vrot.lane.b32.xlu1 %v832_v55, %s2592_s24 }
 0x102   : > { %1830 = vrot.lane.b32.xlu0 %v1818_v38, %s2589_s14  ;;  %v472_v38 = vsel %vm471_vm5, %v470_v21, %v449_v56  ;;  %v1660_v21 = vsel %vm477_vm8, %v3073_v15, %v3175_v12  ;;  %v2319_v15 = vld [vmem:[%s3368_s2 + $0x10] sm:$0xff] }
 0x103   : > { %862 = vrot.lane.b32.xlu1 %v836_v51, %s2593_s30  ;;  %v474_v42 = vsel %vm473_vm6, %v472_v38, %v453_v58  ;;  %v1661_v38 = vsel %vm479_vm10, %v1660_v21, %v3177_v14 }
 0x106   : > { %1838 = vrot.lane.b32.xlu0 %v1819_v39, %s2591_s29  ;;  %v476_v39 = vsel %vm475_vm7, %v474_v42, %v457_v31 }
 0x107   : > { %1041 = vrot.lane.b32.xlu1 %v1036_v33, %s2587_s9 }
 0x10a   : > { %1842 = vrot.lane.b32.xlu0 %v1816_v49, %s2592_s24 }
 0x10b   : > { %1045 = vrot.lane.b32.xlu1 %v1019_v62, %s2588_s13 }
 0x10e   : > { %1846 = vrot.lane.b32.xlu0 %v1820_v24, %s2593_s30 }
 0x10f   : > { %1049 = vrot.lane.b32.xlu1 %v1037_v5, %s2589_s14  ;;  %v2314_v5 = vld [vmem:[%s3368_s2 + $0x8] sm:$0xff] }
 0x112   : > { %2016 = vrot.lane.b32.xlu0 %v2011_v2, %s2587_s9  ;;  %v481_v2 = vld [vmem:[%s3368_s2] sm:$0xff]  ;;  %s354_s9 = scalar_lea.vmem %s3369_s3, %s2311_s8 }
 0x113   : > { %1053 = vrot.lane.b32.xlu1 %v1028_v40, %s2590_s28 }
 0x116   : > { %2020 = vrot.lane.b32.xlu0 %v1994_v44, %s2588_s13 }
 0x117   : > { %1057 = vrot.lane.b32.xlu1 %v1038_v50, %s2591_s29 }
 0x11a   : > { %2024 = vrot.lane.b32.xlu0 %v2012_v57, %s2589_s14 }
 0x11b   : > { %1061 = vrot.lane.b32.xlu1 %v1035_v7, %s2592_s24 }
 0x11e   : > { %2028 = vrot.lane.b32.xlu0 %v2003_v59, %s2590_s28  ;;  %s362_s28 = scalar_lea.vmem %s3370_s4, %s2311_s8 }
 0x11f   : > { %1065 = vrot.lane.b32.xlu1 %v1039_v52, %s2593_s30 }
 0x122   : > { %2032 = vrot.lane.b32.xlu0 %v2013_v27, %s2591_s29 }
 0x126   : > { %2036 = vrot.lane.b32.xlu0 %v2010_v45, %s2592_s24 }
 0x12a   : > { %2040 = vrot.lane.b32.xlu0 %v2014_v61, %s2593_s30 }
 0x130   : > { %v572_v10 = vpop.permute.xlu1 %571 }
 0x134   : > { %v580_v11 = vpop.permute.xlu1 %579 }
 0x138   : > { %v1434_v54 = vpop.permute.xlu0 %1433 }
 0x139   : > { %v588_v16 = vpop.permute.xlu1 %587 }
 0x13c   : > { %v1442_v18 = vpop.permute.xlu0 %1441 }
 0x140   : > { %v3181_v63 = vpop.permute.xlu0 %1449 }
 0x141   : > { %v3179_v22 = vpop.permute.xlu1 %842 }
 0x145   : > { %v3183_v48 = vpop.permute.xlu1 %850 }
 0x148   : > { %v3188_v25 = vpop.permute.xlu0 %1826 }
 0x149   : > { %v568_v55 = vpop.permute.xlu1 %567 }
 0x14a   : > { %v594_v4 = vsel %vm467_vm2, %v2979_v0, %v568_v55  ;;  %v478_v0 = vsel %vm477_vm8, %v476_v39, %v461_v60  ;;  %v2325_v60 = vld [vmem:[%s3368_s2 + $0x20] sm:$0xff]  ;;  %v2328_v55 = vld [vmem:[%s3368_s2 + $0x28] sm:$0xff] }
 0x14b   : > { %v595_v6 = vsel %vm469_vm4, %v594_v4, %v572_v10  ;;  %v480_v40 = vsel %vm479_vm10, %v478_v0, %v465_v53 }
 0x14c   : > { %v3193_v51 = vpop.permute.xlu0 %1834 }
 0x14d   : > { %v576_v26 = vpop.permute.xlu1 %575 }
 0x14e   : > { %v596_v33 = vsel %vm471_vm5, %v595_v6, %v576_v26 }
 0x14f   : > { %v597_v34 = vsel %vm473_vm6, %v596_v33, %v580_v11 }
 0x150   : > { %v1236_v1 = vpop.permute.xlu0 %1235 }
 0x151   : > { %v584_v17 = vpop.permute.xlu1 %583  ;;  %v1262_v50 = vsel %vm467_vm2, %v3025_v47, %v1236_v1  ;;  %v2331_v1 = vld [vmem:[%s3368_s2 + $0x30] sm:$0xff] }
 0x152   : > { %v598_v62 = vsel %vm475_vm7, %v597_v34, %v584_v17 }
 0x153   : > { %v599_v3 = vsel %vm477_vm8, %v598_v62, %v588_v16 }
 0x154   : > { %v1244_v28 = vpop.permute.xlu0 %1243 }
 0x155   : > { %v592_v49 = vpop.permute.xlu1 %591 }
 0x156   : > { %v600_v24 = vsel %vm479_vm10, %v599_v3, %v592_v49 }
 0x157   : > { %2361 = vmatpush3.msk.msra.mxu1 %vm607_vm9, %v600_v24 }
 0x158   : > { %2365 = vmatprep.subr.mxu1 %v2582_v8  ;;  %2363 = vmatmul.mubr.msk.f32.vlgmr.msra.gmra.mrb[0].mxu1 %vm603_vm11, %v2314_v5  ;;  %v1252_v41 = vpop.permute.xlu0 %1251  ;;  %v2334_v5 = vld [vmem:[%s3368_s2 + $0x38] sm:$0xff] }
 0x159   : > { %2366 = vmatpush3.msk.msra.mxu1 %vm607_vm9, %v480_v40  ;;  %v839_v43 = vpop.permute.xlu1 %838  ;;  %2367 = vmatprep.mubr.msk.f32.mxu1 %vm2594_vm3, %v2582_v8 }
 0x15a   : > { %2370 = vmatprep.subr.mxu1 %v2582_v8  ;;  %v865_v53 = vsel %vm467_vm2, %v3050_v9, %v839_v43 }
 0x15c   : > { %v1260_v30 = vpop.permute.xlu0 %1259 }
 0x15d   : > { %v847_v32 = vpop.permute.xlu1 %846 }
 0x160   : > { %2368 = vmatmul.mubr.msk.f32.vlgmr.msra.gmra.mrb[0].mxu1 %vm603_vm11, %v481_v2  ;;  %v1430_v35 = vpop.permute.xlu0 %1429 }
 0x161   : > { %v1240_v37 = vpop.permute.xlu1 %1239  ;;  %2372 = vmatprep.mubr.msk.f32.mxu1 %vm2594_vm3, %v2582_v8  ;;  %v1456_v44 = vsel %vm467_vm2, %v3068_v13, %v1430_v35 }
 0x162   : > { %v1263_v56 = vsel %vm469_vm4, %v1262_v50, %v1240_v37  ;;  %v1457_v7 = vsel %vm469_vm4, %v1456_v44, %v1434_v54 }
 0x163   : > { %v1264_v57 = vsel %vm471_vm5, %v1263_v56, %v1244_v28 }
 0x164   : > { %v1438_v23 = vpop.permute.xlu0 %1437 }
 0x165   : > { %v1248_v52 = vpop.permute.xlu1 %1247  ;;  %v1458_v58 = vsel %vm471_vm5, %v1457_v7, %v1438_v23 }
 0x166   : > { %v1265_v47 = vsel %vm473_vm6, %v1264_v57, %v1248_v52  ;;  %v1459_v59 = vsel %vm473_vm6, %v1458_v58, %v1442_v18  ;;  %v866_v18 = vsel %vm469_vm4, %v865_v53, %v3179_v22 }
 0x167   : > { %v1266_v27 = vsel %vm475_vm7, %v1265_v47, %v1252_v41  ;;  %v867_v9 = vsel %vm471_vm5, %v866_v18, %v847_v32 }
 0x168   : > { %v1446_v20 = vpop.permute.xlu0 %1445  ;;  %v868_v4 = vsel %vm473_vm6, %v867_v9, %v3183_v48 }
 0x169   : > { %v1256_v31 = vpop.permute.xlu1 %1255  ;;  %v1460_v13 = vsel %vm475_vm7, %v1459_v59, %v1446_v20 }
 0x16a   : > { %v1267_v45 = vsel %vm477_vm8, %v1266_v27, %v1256_v31  ;;  %v1461_v10 = vsel %vm477_vm8, %v1460_v13, %v3181_v63  ;;  %v2337_v13 = vld [vmem:[%s3368_s2 + $0x40] sm:$0xff] }
 0x16b   : > { %v1268_v61 = vsel %vm479_vm10, %v1267_v45, %v1260_v30 }
 0x16c   : > { %2381 = vmatpush3.msk.msra.mxu0 %vm607_vm9, %v1268_v61  ;;  %v1454_v11 = vpop.permute.xlu0 %1453 }
 0x16d   : > { %2383 = vmatmul.mubr.msk.f32.vlgmr.msra.gmra.mrb[0].mxu0 %vm603_vm11, %v2325_v60  ;;  %v855_v54 = vpop.permute.xlu1 %854  ;;  %2385 = vmatprep.subr.mxu0 %v2582_v8  ;;  %v1462_v16 = vsel %vm479_vm10, %v1461_v10, %v1454_v11 }
 0x16e   : > { %2387 = vmatprep.mubr.msk.f32.mxu0 %vm2594_vm3, %v2582_v8  ;;  %2386 = vmatpush3.msk.msra.mxu0 %vm607_vm9, %v1462_v16  ;;  %v869_v22 = vsel %vm475_vm7, %v868_v4, %v855_v54 }
 0x16f   : > { %2390 = vmatprep.subr.mxu0 %v2582_v8 }
 0x170   : > { %v1823_v63 = vpop.permute.xlu0 %1822 }
 0x171   : > { %v859_v19 = vpop.permute.xlu1 %858  ;;  %v1849_v14 = vsel %vm467_vm2, %v3096_v46, %v1823_v63 }
 0x172   : > { %v870_v6 = vsel %vm477_vm8, %v869_v22, %v859_v19  ;;  %v1850_v34 = vsel %vm469_vm4, %v1849_v14, %v3188_v25 }
 0x174   : > { %v1831_v26 = vpop.permute.xlu0 %1830 }
 0x175   : > { %2388 = vmatmul.mubr.msk.f32.vlgmr.msra.gmra.mrb[0].mxu0 %vm603_vm11, %v2328_v55  ;;  %v863_v33 = vpop.permute.xlu1 %862  ;;  %v1851_v17 = vsel %vm471_vm5, %v1850_v34, %v1831_v26 }
 0x176   : > { %2391 = vmatpush3.msk.msra.mxu0 %vm607_vm9, %v1661_v38  ;;  %v871_v12 = vsel %vm479_vm10, %v870_v6, %v863_v33  ;;  %2392 = vmatprep.mubr.msk.f32.mxu0 %vm2594_vm3, %v2582_v8  ;;  %v1852_v62 = vsel %vm473_vm6, %v1851_v17, %v3193_v51 }
 0x177   : > { %2371 = vmatpush3.msk.msra.mxu1 %vm607_vm9, %v871_v12  ;;  %2395 = vmatprep.subr.mxu0 %v2582_v8 }
 0x178   : > { %2373 = vmatmul.mubr.msk.f32.vlgmr.msra.gmra.mrb[0].mxu1 %vm603_vm11, %v2319_v15  ;;  %2375 = vmatprep.subr.mxu1 %v2582_v8  ;;  %v1839_v48 = vpop.permute.xlu0 %1838 }
 0x179   : > { %v1042_v42 = vpop.permute.xlu1 %1041  ;;  %2377 = vmatprep.mubr.msk.f32.mxu1 %vm2594_vm3, %v2582_v8  ;;  %v1853_v0 = vsel %vm475_vm7, %v1852_v62, %v1839_v48 }
 0x17a   : > { %v1068_v24 = vsel %vm467_vm2, %v3109_v36, %v1042_v42 }
 0x17c   : > { %v1843_v39 = vpop.permute.xlu0 %1842 }
 0x17d   : > { %v1046_v46 = vpop.permute.xlu1 %1045  ;;  %2393 = vmatmul.mubr.msk.f32.vlgmr.msra.gmra.mrb[0].mxu0 %vm603_vm11, %v2331_v1  ;;  %v1854_v28 = vsel %vm477_vm8, %v1853_v0, %v1843_v39 }
 0x17e   : > { %2397 = vmatprep.mubr.msk.f32.mxu0 %vm2594_vm3, %v2582_v8  ;;  %v1069_v41 = vsel %vm469_vm4, %v1068_v24, %v1046_v46 }
 0x180   : > { %v1847_v49 = vpop.permute.xlu0 %1846 }
 0x181   : > { %v1050_v3 = vpop.permute.xlu1 %1049  ;;  %v1855_v25 = vsel %vm479_vm10, %v1854_v28, %v1847_v49 }
 0x182   : > { %2396 = vmatpush3.msk.msra.mxu0 %vm607_vm9, %v1855_v25  ;;  %v1070_v32 = vsel %vm471_vm5, %v1069_v41, %v1050_v3 }
 0x183   : > { %2400 = vmatprep.subr.mxu0 %v2582_v8 }
 0x184   : > { %v2017_v51 = vpop.permute.xlu0 %2016 }
 0x185   : > { %v1054_v40 = vpop.permute.xlu1 %1053  ;;  %2398 = vmatmul.mubr.msk.f32.vlgmr.msra.gmra.mrb[0].mxu0 %vm603_vm11, %v2334_v5  ;;  %v2043_v57 = vsel %vm467_vm2, %v3138_v29, %v2017_v51 }
 0x186   : > { %2402 = vmatprep.mubr.msk.f32.mxu0 %vm2594_vm3, %v2582_v8  ;;  %v1071_v2 = vsel %vm473_vm6, %v1070_v32, %v1054_v40  ;;  %v2322_v8 = vld [vmem:[%s3368_s2 + $0x18] sm:$0xff] }
 0x188   : > { %v2021_v43 = vpop.permute.xlu0 %2020 }
 0x189   : > { %v1058_v30 = vpop.permute.xlu1 %1057  ;;  %v2044_v52 = vsel %vm469_vm4, %v2043_v57, %v2021_v43 }
 0x18a   : > { %v1072_v36 = vsel %vm475_vm7, %v1071_v2, %v1058_v30 }
 0x18c   : > { %v2025_v50 = vpop.permute.xlu0 %2024 }
 0x18d   : > { %v1062_v35 = vpop.permute.xlu1 %1061  ;;  %v2045_v47 = vsel %vm471_vm5, %v2044_v52, %v2025_v50 }
 0x18e   : > { %v1073_v37 = vsel %vm477_vm8, %v1072_v36, %v1062_v35 }
 0x190   : > { %v2029_v44 = vpop.permute.xlu0 %2028 }
 0x191   : > { %v1066_v56 = vpop.permute.xlu1 %1065  ;;  %v2046_v59 = vsel %vm473_vm6, %v2045_v47, %v2029_v44 }
 0x192   : > { %v1074_v7 = vsel %vm479_vm10, %v1073_v37, %v1066_v56 }
 0x193   : > { %2376 = vmatpush3.msk.msra.mxu1 %vm607_vm9, %v1074_v7 }
 0x194   : > { %2378 = vmatmul.mubr.msk.f32.vlgmr.msra.gmra.mrb[0].mxu1 %vm603_vm11, %v2322_v8  ;;  %v2033_v23 = vpop.permute.xlu0 %2032 }
 0x195   : > { %v2047_v20 = vsel %vm475_vm7, %v2046_v59, %v2033_v23 }
 0x198   : > { %v2037_v58 = vpop.permute.xlu0 %2036 }
 0x199   : > { %v2048_v27 = vsel %vm477_vm8, %v2047_v20, %v2037_v58 }
 0x19c   : > { %v2041_v31 = vpop.permute.xlu0 %2040 }
 0x19d   : > { %v2049_v45 = vsel %vm479_vm10, %v2048_v27, %v2041_v31 }
 0x19e   : > { %2401 = vmatpush3.msk.msra.mxu0 %vm607_vm9, %v2049_v45 }
 0x19f   : > { %2403 = vmatmul.mubr.msk.f32.vlgmr.msra.gmra.mrb[0].mxu0 %vm603_vm11, %v2337_v13 }
 0x267   : > { %v1149_v29 = vpop.f32.mrb[0].mxu1 }
 0x268   : > { %v2379_v60 = vpop.f32.mrb[1].mxu1 }
 0x272   : > { %v2124_v61 = vpop.f32.mrb[0].mxu0 }
 0x273   : > { %v2405_v53 = vadd.f32 %v2124_v61, %v1149_v29  ;;  %v2404_v10 = vpop.f32.mrb[1].mxu0 }
 0x275   : > { %2129 = vst [vmem:[%s354_s9] sm:$0xff] %v2405_v53  ;;  %2130 = vadd.xlane.f32.xlu1 %v2405_v53  ;;  %v2132_v11 = vmul.f32 %v2405_v53, %v2405_v53 }
 0x277   : > { %2133 = vadd.xlane.f32.xlu0 %v2132_v11 }
 0x302   : > { %v2131_v54 = vpop.xlane.xlu1 %2130 }
 0x304   : > { %v2134_v16 = vpop.xlane.xlu0 %2133 }
 0x305   : > { %v2136_v18 = vsel %vm2135_vm12, %v2131_v54, %v2134_v16 }
 0x306   : > { %2138 = vst.msk [vmem:[%s362_s28] sm:$0xff] %vm2137_vm13, %v2136_v18 }
 0x307 PF: > { %s15_s23 = sadd.s32 1, %s2580_s23   ;;  %s3373_s15 = smov %s2552_s16 }
 0x308   : > { %p12_p1 = scmp.ge.s32.totalorder %s15_s23, 6   ;;  %s3374_s16 = smov %s2700_s12 }
 0x309   : > { %s3375_s17 = smov %s2560_s18  ;;  %s3376_s18 = smov %s2697_s11 }
 0x30a   : > { %s3377_s19 = smov %s2572_s21  ;;  %s3378_s20 = smov %s2576_s22 }
 0x30b   : > { %s3379_s21 = smov %s2670_s26  ;;  %s3380_s22 = smov %s3384_s25 }
 0x30c   :  { %14 = sbr.rel (!%p12_p1) target bundleno = 5 (0x5), region = 171 }

</bundles_post_ra>
